<compile_context>
chip_gen: v7x
topology: tpu7x:2x2x1
jax: 0.10.0
libtpu: 0.0.40
codegen_flags: <defaults>
</compile_context>

<pallas_src>
import jax
import jax.numpy as jnp
from jax.experimental import pallas as pl
from jax.experimental.pallas import tpu as pltpu

# ----------------------------- config ---------------------------------------
B, S = 2, 8          # batch, sequence length
VOCAB = 64           # vocab size
H = 32               # hidden size
NH = 4               # attention heads
DH = H // NH         # head dim
FFN = 64             # intermediate (FFN) size
NLAYERS = 2          # transformer layers
PAD_ID = 0           # pad token id used by tensorizer.get_attn_mask
LN_EPS = 1e-12
SCALE = 1.0 / float(DH) ** 0.5
SLAB_W = 128         # lane width of the packed weight slab


# ----------------------------- shared math -----------------------------------
def _ln(x, g, b):
    mu = jnp.mean(x, axis=-1, keepdims=True)
    var = jnp.mean((x - mu) ** 2, axis=-1, keepdims=True)
    return (x - mu) * jax.lax.rsqrt(var + LN_EPS) * g + b


# ----------------------------- weight-slab layout -----------------------------
def _slab_entries():
    entries = [("word_emb", None, VOCAB, H),
               ("pos_type", None, B * S, H),
               ("emb_ln_g", None, 1, H),
               ("emb_ln_b", None, 1, H)]
    for l in range(NLAYERS):
        entries += [("wqkv", l, H, 3 * H), ("bqkv", l, 1, 3 * H),
                    ("wo", l, H, H), ("bo", l, 1, H),
                    ("ln1_g", l, 1, H), ("ln1_b", l, 1, H),
                    ("w1", l, H, FFN), ("b1", l, 1, FFN),
                    ("w2", l, FFN, H), ("b2", l, 1, H),
                    ("ln2_g", l, 1, H), ("ln2_b", l, 1, H)]
    return entries


def _round8(n):
    return ((n + 7) // 8) * 8


def _slab_offsets():
    offs, r = {}, 0
    for name, l, rows, cols in _slab_entries():
        offs[(name, l)] = (r, rows, cols)
        r += _round8(rows)                      # keep every slice 8-row aligned
    return offs, r


_SLAB_OFFS, _SLAB_ROWS = _slab_offsets()


# ----------------------------- fused kernel ----------------------------------
def _fused_encoder_kernel(
    ids_col_ref,      # (B*S, 1)  int32  token ids, tokens on sublanes
    ids_row_ref,      # (B, 1, S) int32  token ids, keys on lanes
    w_ref,            # (_SLAB_ROWS, 128) f32 packed weight slab
    out_ref,          # (B, H)    pooled output
    ctx_ref,          # (B*S, H)  VMEM scratch: per-head attention outputs
):
    def wslice(name, l=None):
        r, n, c = _SLAB_OFFS[(name, l)]
        return w_ref[r:r + n, 0:c]

    # --- attention mask (tensorizer.get_attn_mask: token != pad_id) ---------
    mask_add = (1.0 - (ids_row_ref[...] != PAD_ID).astype(jnp.float32)) * -1e9
    # mask_add: (B, 1, S), broadcasts over query positions.

    # --- embeddings: one-hot MXU gather + pre-folded pos/type + LN ----------
    vocab_iota = jax.lax.broadcasted_iota(jnp.int32, (B * S, VOCAB), 1)
    onehot = (ids_col_ref[...] == vocab_iota).astype(jnp.float32)  # (B*S, V)
    h = jnp.dot(onehot, wslice("word_emb"),
                preferred_element_type=jnp.float32)                # (B*S, H)
    h = h + wslice("pos_type")                 # host-prefolded pos + type emb
    h = _ln(h, wslice("emb_ln_g"), wslice("emb_ln_b"))

    # --- transformer layers (fully unrolled, resident in VMEM/vregs) --------
    for l in range(NLAYERS):
        # fused QKV projection: one (H, 3H) matmul.
        qkv = (jnp.dot(h, wslice("wqkv", l),
                       preferred_element_type=jnp.float32)
               + wslice("bqkv", l))                                # (B*S, 3H)

        # per-head, batched over B with single-batch-dim dot_general;
        # head outputs land in the VMEM ctx scratch (no lane concat).
        for hd in range(NH):
            c = hd * DH
            q_h = qkv[:, c:c + DH].reshape(B, S, DH)
            k_h = qkv[:, H + c:H + c + DH].reshape(B, S, DH)
            v_h = qkv[:, 2 * H + c:2 * H + c + DH].reshape(B, S, DH)
            s = jax.lax.dot_general(
                q_h, k_h, (((2,), (2,)), ((0,), (0,))),
                preferred_element_type=jnp.float32) * SCALE + mask_add
            # maskless softmax: -1e9 entries underflow to 0; unmasked scores
            # are O(1) here, so no max-subtraction is needed.
            p = jnp.exp(s)
            p = p * pl.reciprocal(jnp.sum(p, axis=-1, keepdims=True),
                                  approx=True)
            ctx_h = jax.lax.dot_general(
                p, v_h, (((2,), (1,)), ((0,), (0,))),
                preferred_element_type=jnp.float32)                # (B, S, DH)
            ctx_ref[:, c:c + DH] = ctx_h.reshape(B * S, DH)

        attn_out = (jnp.dot(ctx_ref[...], wslice("wo", l),
                            preferred_element_type=jnp.float32)
                    + wslice("bo", l))
        h = _ln(attn_out + h, wslice("ln1_g", l), wslice("ln1_b", l))

        ff = (jnp.dot(h, wslice("w1", l),
                      preferred_element_type=jnp.float32)
              + wslice("b1", l))
        # TODO(synk): BERT uses exact (erf) GELU; tanh approximation used here.
        ff = jax.nn.gelu(ff, approximate=True)
        ff = (jnp.dot(ff, wslice("w2", l),
                      preferred_element_type=jnp.float32)
              + wslice("b2", l))
        h = _ln(ff + h, wslice("ln2_g", l), wslice("ln2_b", l))

    # --- pooled output: hidden state at representation_token_pos = 0 --------
    for b in range(B):
        out_ref[b:b + 1, :] = h[b * S:b * S + 1, :]


# ----------------------------- wrapper ---------------------------------------
def forward_passage(x_ids, slab):
    ids_col = x_ids.reshape(B * S, 1).astype(jnp.int32)
    ids_row = x_ids.reshape(B, 1, S).astype(jnp.int32)
    return pl.pallas_call(
        _fused_encoder_kernel,
        out_shape=jax.ShapeDtypeStruct((B, H), jnp.float32),
        in_specs=[pl.BlockSpec(memory_space=pltpu.MemorySpace.VMEM)] * 3,
        out_specs=pl.BlockSpec(memory_space=pltpu.MemorySpace.VMEM),
        scratch_shapes=[pltpu.VMEM((B * S, H), jnp.float32)],
    )(ids_col, ids_row, slab)


# ----------------------------- params ----------------------------------------
def init_params(key):
    def nrm(k, shape, scale=0.02):
        return (scale * jax.random.normal(k, shape)).astype(jnp.float32)

    keys = iter(jax.random.split(key, 8 + NLAYERS * 16))
    params = {
        "word_emb": nrm(next(keys), (VOCAB, H)),
        "pos_emb": nrm(next(keys), (S, H)),
        "type_emb": nrm(next(keys), (2, H)),
        "emb_ln_g": jnp.ones((H,), jnp.float32),
        "emb_ln_b": jnp.zeros((H,), jnp.float32),
        "layers": [],
    }
    for _ in range(NLAYERS):
        lp = {
            "wq": nrm(next(keys), (H, H)), "bq": nrm(next(keys), (H,)),
            "wk": nrm(next(keys), (H, H)), "bk": nrm(next(keys), (H,)),
            "wv": nrm(next(keys), (H, H)), "bv": nrm(next(keys), (H,)),
            "wo": nrm(next(keys), (H, H)), "bo": nrm(next(keys), (H,)),
            "ln1_g": jnp.ones((H,), jnp.float32),
            "ln1_b": jnp.zeros((H,), jnp.float32),
            "w1": nrm(next(keys), (H, FFN)), "b1": nrm(next(keys), (FFN,)),
            "w2": nrm(next(keys), (FFN, H)), "b2": nrm(next(keys), (H,)),
            "ln2_g": jnp.ones((H,), jnp.float32),
            "ln2_b": jnp.zeros((H,), jnp.float32),
        }
        params["layers"].append(lp)
    return params


def pack_params(params):
    """Fuse Q/K/V, pre-fold pos+type embeddings, reshape to 2-D rows."""
    layers = params["layers"]

    def st(name, shape):
        return jnp.stack([lp[name].reshape(shape) for lp in layers])

    wqkv = jnp.stack(
        [jnp.concatenate([lp["wq"], lp["wk"], lp["wv"]], axis=1)
         for lp in layers])                                       # (L, H, 3H)
    bqkv = jnp.stack(
        [jnp.concatenate([lp["bq"], lp["bk"], lp["bv"]]).reshape(1, 3 * H)
         for lp in layers])                                       # (L, 1, 3H)
    pos_type = (jnp.tile(params["pos_emb"], (B, 1))
                + params["type_emb"][0:1, :])                     # (B*S, H)

    return {
        "word_emb": params["word_emb"],
        "pos_type": pos_type,
        "emb_ln_g": params["emb_ln_g"].reshape(1, H),
        "emb_ln_b": params["emb_ln_b"].reshape(1, H),
        "wqkv": wqkv, "bqkv": bqkv,
        "wo": st("wo", (H, H)), "bo": st("bo", (1, H)),
        "ln1_g": st("ln1_g", (1, H)), "ln1_b": st("ln1_b", (1, H)),
        "w1": st("w1", (H, FFN)), "b1": st("b1", (1, FFN)),
        "w2": st("w2", (FFN, H)), "b2": st("b2", (1, H)),
        "ln2_g": st("ln2_g", (1, H)), "ln2_b": st("ln2_b", (1, H)),
    }


def build_slab(packed):
    """Pack all weights into one (rows, 128) f32 slab, 8-row aligned entries."""
    blocks = []
    for name, l, rows, cols in _slab_entries():
        a = packed[name] if l is None else packed[name][l]
        a = jnp.asarray(a, jnp.float32).reshape(rows, cols)
        rpad = _round8(rows) - rows
        blocks.append(jnp.pad(a, ((0, rpad), (0, SLAB_W - cols))))
    slab = jnp.concatenate(blocks, axis=0)
    assert slab.shape == (_SLAB_ROWS, SLAB_W), slab.shape
    return slab


# ----------------------------- pure-JAX reference ----------------------------
def _reference_forward(x_ids, packed):
    mask_add = (1.0 - (x_ids != PAD_ID).astype(jnp.float32)) * -1e9   # (B, S)
    onehot = jax.nn.one_hot(x_ids.reshape(B * S), VOCAB, dtype=jnp.float32)
    h = onehot @ packed["word_emb"] + packed["pos_type"]
    h = _ln(h, packed["emb_ln_g"], packed["emb_ln_b"])
    for l in range(NLAYERS):
        qkv = h @ packed["wqkv"][l] + packed["bqkv"][l]
        q = qkv[:, :H].reshape(B, S, NH, DH).transpose(0, 2, 1, 3)
        k = qkv[:, H:2 * H].reshape(B, S, NH, DH).transpose(0, 2, 1, 3)
        v = qkv[:, 2 * H:].reshape(B, S, NH, DH).transpose(0, 2, 1, 3)
        s = (jnp.einsum("bhqd,bhkd->bhqk", q, k) * SCALE
             + mask_add[:, None, None, :])
        p = jax.nn.softmax(s, axis=-1)
        ctx = jnp.einsum("bhqk,bhkd->bhqd", p, v)
        ctx = ctx.transpose(0, 2, 1, 3).reshape(B * S, H)
        h = _ln(ctx @ packed["wo"][l] + packed["bo"][l] + h,
                packed["ln1_g"][l], packed["ln1_b"][l])
        ff = jax.nn.gelu(h @ packed["w1"][l] + packed["b1"][l],
                         approximate=True)
        h = _ln(ff @ packed["w2"][l] + packed["b2"][l] + h,
                packed["ln2_g"][l], packed["ln2_b"][l])
    return h.reshape(B, S, H)[:, 0, :]


# ----------------------------- main -------------------------------------------
if __name__ == "__main__":
    key = jax.random.PRNGKey(0)
    pkey, xkey = jax.random.split(key)
    params = init_params(pkey)
    packed = pack_params(params)
    slab = build_slab(packed)

    # token ids; id 0 acts as [PAD] so the attention mask is exercised.
    x = jax.random.randint(xkey, (B, S), 0, VOCAB, dtype=jnp.int32)

    fwd = jax.jit(forward_passage)
    out = jax.block_until_ready(fwd(x, slab))

    assert out.shape == (B, H), out.shape
    assert out.dtype == jnp.float32, out.dtype
    assert bool(jnp.all(jnp.isfinite(out)))

    ref = _reference_forward(x, packed)
    assert bool(jnp.allclose(out, ref, atol=5e-2, rtol=5e-2)), (
        float(jnp.max(jnp.abs(out - ref))))

    print("KERNEL_OK")
</pallas_src>

<mosaic_0001>
module attributes {stable_mosaic.version = 11 : i64} {
  func.func @_fused_encoder_kernel(%arg0: memref<16x1xi32, #tpu.memory_space<vmem>>, %arg1: memref<2x1x8xi32, #tpu.memory_space<vmem>>, %arg2: memref<544x128xf32, #tpu.memory_space<vmem>>, %arg3: memref<2x32xf32, #tpu.memory_space<vmem>>, %arg4: memref<16x32xf32, #tpu.memory_space<vmem>>) attributes {dimension_semantics = [], scalar_prefetch = 0 : i64, scratch_operands = 1 : i64, tpu.core_type = #tpu.core_type<tc>} {
    %c0 = arith.constant 0 : index
    %c0_0 = arith.constant 0 : index
    %c0_1 = arith.constant 0 : index
    %0 = vector.load %arg1[%c0, %c0_0, %c0_1] : memref<2x1x8xi32, #tpu.memory_space<vmem>>, vector<2x1x8xi32>
    %c0_i32 = arith.constant 0 : i32
    %1 = vector.broadcast %c0_i32 : i32 to vector<2x1x8xi32>
    %2 = arith.cmpi ne, %0, %1 : vector<2x1x8xi32>
    %3 = arith.extui %2 : vector<2x1x8xi1> to vector<2x1x8xi32>
    %4 = arith.sitofp %3 : vector<2x1x8xi32> to vector<2x1x8xf32>
    %cst = arith.constant 1.000000e+00 : f32
    %5 = vector.broadcast %cst : f32 to vector<2x1x8xf32>
    %6 = arith.subf %5, %4 : vector<2x1x8xf32>
    %cst_2 = arith.constant -1.000000e+09 : f32
    %7 = vector.broadcast %cst_2 : f32 to vector<2x1x8xf32>
    %8 = arith.mulf %6, %7 : vector<2x1x8xf32>
    %9 = tpu.iota {dimensions = array<i32: 1>} : vector<16x64xi32>
    %c0_3 = arith.constant 0 : index
    %c0_4 = arith.constant 0 : index
    %10 = vector.load %arg0[%c0_3, %c0_4] : memref<16x1xi32, #tpu.memory_space<vmem>>, vector<16x1xi32>
    %11 = vector.broadcast %10 : vector<16x1xi32> to vector<16x64xi32>
    %12 = arith.cmpi eq, %11, %9 : vector<16x64xi32>
    %13 = arith.extui %12 : vector<16x64xi1> to vector<16x64xi32>
    %14 = arith.sitofp %13 : vector<16x64xi32> to vector<16x64xf32>
    %c0_5 = arith.constant 0 : index
    %c0_6 = arith.constant 0 : index
    %15 = vector.load %arg2[%c0_5, %c0_6] : memref<544x128xf32, #tpu.memory_space<vmem>>, vector<64x32xf32>
    %cst_7 = arith.constant dense<0.000000e+00> : vector<16x32xf32>
    %16 = tpu.matmul %14, %15, %cst_7 {dimension_numbers = #tpu.dot_dimension_numbers<[1], [0], [0], [1], [0, 0, 1, 1], [], []>} : vector<16x64xf32>, vector<64x32xf32>, vector<16x32xf32> -> vector<16x32xf32>
    %c64 = arith.constant 64 : index
    %c0_8 = arith.constant 0 : index
    %17 = vector.load %arg2[%c64, %c0_8] : memref<544x128xf32, #tpu.memory_space<vmem>>, vector<16x32xf32>
    %18 = arith.addf %16, %17 : vector<16x32xf32>
    %c80 = arith.constant 80 : index
    %c0_9 = arith.constant 0 : index
    %19 = vector.load %arg2[%c80, %c0_9] : memref<544x128xf32, #tpu.memory_space<vmem>>, vector<1x32xf32>
    %c88 = arith.constant 88 : index
    %c0_10 = arith.constant 0 : index
    %20 = vector.load %arg2[%c88, %c0_10] : memref<544x128xf32, #tpu.memory_space<vmem>>, vector<1x32xf32>
    %cst_11 = arith.constant dense<0.000000e+00> : vector<16xf32>
    %21 = vector.multi_reduction <add>, %18, %cst_11 [1] : vector<16x32xf32> to vector<16xf32>
    %22 = vector.shape_cast %21 : vector<16xf32> to vector<16x1xf32>
    %cst_12 = arith.constant 3.200000e+01 : f32
    %23 = vector.broadcast %cst_12 : f32 to vector<16x1xf32>
    %24 = arith.divf %22, %23 : vector<16x1xf32>
    %25 = vector.broadcast %24 : vector<16x1xf32> to vector<16x32xf32>
    %26 = arith.subf %18, %25 : vector<16x32xf32>
    %27 = arith.mulf %26, %26 : vector<16x32xf32>
    %cst_13 = arith.constant dense<0.000000e+00> : vector<16xf32>
    %28 = vector.multi_reduction <add>, %27, %cst_13 [1] : vector<16x32xf32> to vector<16xf32>
    %29 = vector.shape_cast %28 : vector<16xf32> to vector<16x1xf32>
    %cst_14 = arith.constant 3.200000e+01 : f32
    %30 = vector.broadcast %cst_14 : f32 to vector<16x1xf32>
    %31 = arith.divf %29, %30 : vector<16x1xf32>
    %32 = vector.broadcast %24 : vector<16x1xf32> to vector<16x32xf32>
    %33 = arith.subf %18, %32 : vector<16x32xf32>
    %cst_15 = arith.constant 9.99999996E-13 : f32
    %34 = vector.broadcast %cst_15 : f32 to vector<16x1xf32>
    %35 = arith.addf %31, %34 : vector<16x1xf32>
    %36 = math.rsqrt %35 : vector<16x1xf32>
    %37 = vector.broadcast %36 : vector<16x1xf32> to vector<16x32xf32>
    %38 = arith.mulf %33, %37 : vector<16x32xf32>
    %39 = vector.broadcast %19 : vector<1x32xf32> to vector<16x32xf32>
    %40 = arith.mulf %38, %39 : vector<16x32xf32>
    %41 = vector.broadcast %20 : vector<1x32xf32> to vector<16x32xf32>
    %42 = arith.addf %40, %41 : vector<16x32xf32>
    %c96 = arith.constant 96 : index
    %c0_16 = arith.constant 0 : index
    %43 = vector.load %arg2[%c96, %c0_16] : memref<544x128xf32, #tpu.memory_space<vmem>>, vector<32x96xf32>
    %cst_17 = arith.constant dense<0.000000e+00> : vector<16x96xf32>
    %44 = tpu.matmul %42, %43, %cst_17 {dimension_numbers = #tpu.dot_dimension_numbers<[1], [0], [0], [1], [0, 0, 1, 1], [], []>} : vector<16x32xf32>, vector<32x96xf32>, vector<16x96xf32> -> vector<16x96xf32>
    %c128 = arith.constant 128 : index
    %c0_18 = arith.constant 0 : index
    %45 = vector.load %arg2[%c128, %c0_18] : memref<544x128xf32, #tpu.memory_space<vmem>>, vector<1x96xf32>
    %46 = vector.broadcast %45 : vector<1x96xf32> to vector<16x96xf32>
    %47 = arith.addf %44, %46 : vector<16x96xf32>
    %48 = vector.extract_strided_slice %47 {offsets = [0, 0], sizes = [16, 8], strides = [1, 1]} : vector<16x96xf32> to vector<16x8xf32>
    %49 = vector.shape_cast %48 : vector<16x8xf32> to vector<2x8x8xf32>
    %50 = vector.extract_strided_slice %47 {offsets = [0, 32], sizes = [16, 8], strides = [1, 1]} : vector<16x96xf32> to vector<16x8xf32>
    %51 = vector.shape_cast %50 : vector<16x8xf32> to vector<2x8x8xf32>
    %52 = vector.extract_strided_slice %47 {offsets = [0, 64], sizes = [16, 8], strides = [1, 1]} : vector<16x96xf32> to vector<16x8xf32>
    %53 = vector.shape_cast %52 : vector<16x8xf32> to vector<2x8x8xf32>
    %cst_19 = arith.constant dense<0.000000e+00> : vector<2x8x8xf32>
    %54 = tpu.matmul %49, %51, %cst_19 {dimension_numbers = #tpu.dot_dimension_numbers<[2], [2], [1], [1], [0, 0, 0, 1, 1, 1], [0], [0]>} : vector<2x8x8xf32>, vector<2x8x8xf32>, vector<2x8x8xf32> -> vector<2x8x8xf32>
    %cst_20 = arith.constant 0.353553385 : f32
    %55 = vector.broadcast %cst_20 : f32 to vector<2x8x8xf32>
    %56 = arith.mulf %54, %55 : vector<2x8x8xf32>
    %57 = vector.broadcast %8 : vector<2x1x8xf32> to vector<2x8x8xf32>
    %58 = arith.addf %56, %57 : vector<2x8x8xf32>
    %59 = math.exp %58 : vector<2x8x8xf32>
    %cst_21 = arith.constant dense<0.000000e+00> : vector<2x8xf32>
    %60 = vector.multi_reduction <add>, %59, %cst_21 [2] : vector<2x8x8xf32> to vector<2x8xf32>
    %61 = vector.shape_cast %60 : vector<2x8xf32> to vector<2x8x1xf32>
    %62 = tpu.reciprocal %61 {approx = true} : vector<2x8x1xf32> -> vector<2x8x1xf32>
    %63 = vector.broadcast %62 : vector<2x8x1xf32> to vector<2x8x8xf32>
    %64 = arith.mulf %59, %63 : vector<2x8x8xf32>
    %cst_22 = arith.constant dense<0.000000e+00> : vector<2x8x8xf32>
    %65 = tpu.matmul %64, %53, %cst_22 {dimension_numbers = #tpu.dot_dimension_numbers<[2], [1], [1], [2], [0, 0, 0, 1, 1, 2], [0], [0]>} : vector<2x8x8xf32>, vector<2x8x8xf32>, vector<2x8x8xf32> -> vector<2x8x8xf32>
    %66 = vector.shape_cast %65 : vector<2x8x8xf32> to vector<16x8xf32>
    %c0_23 = arith.constant 0 : index
    %c0_24 = arith.constant 0 : index
    %67 = vector.load %arg4[%c0_23, %c0_24] : memref<16x32xf32, #tpu.memory_space<vmem>>, vector<16x8xf32>
    tpu.vector_store %arg4[%c0_23, %c0_24], %66 {strides = array<i32>} : memref<16x32xf32, #tpu.memory_space<vmem>>, vector<16x8xf32>,
    %68 = vector.extract_strided_slice %47 {offsets = [0, 8], sizes = [16, 8], strides = [1, 1]} : vector<16x96xf32> to vector<16x8xf32>
    %69 = vector.shape_cast %68 : vector<16x8xf32> to vector<2x8x8xf32>
    %70 = vector.extract_strided_slice %47 {offsets = [0, 40], sizes = [16, 8], strides = [1, 1]} : vector<16x96xf32> to vector<16x8xf32>
    %71 = vector.shape_cast %70 : vector<16x8xf32> to vector<2x8x8xf32>
    %72 = vector.extract_strided_slice %47 {offsets = [0, 72], sizes = [16, 8], strides = [1, 1]} : vector<16x96xf32> to vector<16x8xf32>
    %73 = vector.shape_cast %72 : vector<16x8xf32> to vector<2x8x8xf32>
    %cst_25 = arith.constant dense<0.000000e+00> : vector<2x8x8xf32>
    %74 = tpu.matmul %69, %71, %cst_25 {dimension_numbers = #tpu.dot_dimension_numbers<[2], [2], [1], [1], [0, 0, 0, 1, 1, 1], [0], [0]>} : vector<2x8x8xf32>, vector<2x8x8xf32>, vector<2x8x8xf32> -> vector<2x8x8xf32>
    %cst_26 = arith.constant 0.353553385 : f32
    %75 = vector.broadcast %cst_26 : f32 to vector<2x8x8xf32>
    %76 = arith.mulf %74, %75 : vector<2x8x8xf32>
    %77 = vector.broadcast %8 : vector<2x1x8xf32> to vector<2x8x8xf32>
    %78 = arith.addf %76, %77 : vector<2x8x8xf32>
    %79 = math.exp %78 : vector<2x8x8xf32>
    %cst_27 = arith.constant dense<0.000000e+00> : vector<2x8xf32>
    %80 = vector.multi_reduction <add>, %79, %cst_27 [2] : vector<2x8x8xf32> to vector<2x8xf32>
    %81 = vector.shape_cast %80 : vector<2x8xf32> to vector<2x8x1xf32>
    %82 = tpu.reciprocal %81 {approx = true} : vector<2x8x1xf32> -> vector<2x8x1xf32>
    %83 = vector.broadcast %82 : vector<2x8x1xf32> to vector<2x8x8xf32>
    %84 = arith.mulf %79, %83 : vector<2x8x8xf32>
    %cst_28 = arith.constant dense<0.000000e+00> : vector<2x8x8xf32>
    %85 = tpu.matmul %84, %73, %cst_28 {dimension_numbers = #tpu.dot_dimension_numbers<[2], [1], [1], [2], [0, 0, 0, 1, 1, 2], [0], [0]>} : vector<2x8x8xf32>, vector<2x8x8xf32>, vector<2x8x8xf32> -> vector<2x8x8xf32>
    %86 = vector.shape_cast %85 : vector<2x8x8xf32> to vector<16x8xf32>
    %c0_29 = arith.constant 0 : index
    %c8 = arith.constant 8 : index
    %87 = vector.load %arg4[%c0_29, %c8] : memref<16x32xf32, #tpu.memory_space<vmem>>, vector<16x8xf32>
    tpu.vector_store %arg4[%c0_29, %c8], %86 {strides = array<i32>} : memref<16x32xf32, #tpu.memory_space<vmem>>, vector<16x8xf32>,
    %88 = vector.extract_strided_slice %47 {offsets = [0, 16], sizes = [16, 8], strides = [1, 1]} : vector<16x96xf32> to vector<16x8xf32>
    %89 = vector.shape_cast %88 : vector<16x8xf32> to vector<2x8x8xf32>
    %90 = vector.extract_strided_slice %47 {offsets = [0, 48], sizes = [16, 8], strides = [1, 1]} : vector<16x96xf32> to vector<16x8xf32>
    %91 = vector.shape_cast %90 : vector<16x8xf32> to vector<2x8x8xf32>
    %92 = vector.extract_strided_slice %47 {offsets = [0, 80], sizes = [16, 8], strides = [1, 1]} : vector<16x96xf32> to vector<16x8xf32>
    %93 = vector.shape_cast %92 : vector<16x8xf32> to vector<2x8x8xf32>
    %cst_30 = arith.constant dense<0.000000e+00> : vector<2x8x8xf32>
    %94 = tpu.matmul %89, %91, %cst_30 {dimension_numbers = #tpu.dot_dimension_numbers<[2], [2], [1], [1], [0, 0, 0, 1, 1, 1], [0], [0]>} : vector<2x8x8xf32>, vector<2x8x8xf32>, vector<2x8x8xf32> -> vector<2x8x8xf32>
    %cst_31 = arith.constant 0.353553385 : f32
    %95 = vector.broadcast %cst_31 : f32 to vector<2x8x8xf32>
    %96 = arith.mulf %94, %95 : vector<2x8x8xf32>
    %97 = vector.broadcast %8 : vector<2x1x8xf32> to vector<2x8x8xf32>
    %98 = arith.addf %96, %97 : vector<2x8x8xf32>
    %99 = math.exp %98 : vector<2x8x8xf32>
    %cst_32 = arith.constant dense<0.000000e+00> : vector<2x8xf32>
    %100 = vector.multi_reduction <add>, %99, %cst_32 [2] : vector<2x8x8xf32> to vector<2x8xf32>
    %101 = vector.shape_cast %100 : vector<2x8xf32> to vector<2x8x1xf32>
    %102 = tpu.reciprocal %101 {approx = true} : vector<2x8x1xf32> -> vector<2x8x1xf32>
    %103 = vector.broadcast %102 : vector<2x8x1xf32> to vector<2x8x8xf32>
    %104 = arith.mulf %99, %103 : vector<2x8x8xf32>
    %cst_33 = arith.constant dense<0.000000e+00> : vector<2x8x8xf32>
    %105 = tpu.matmul %104, %93, %cst_33 {dimension_numbers = #tpu.dot_dimension_numbers<[2], [1], [1], [2], [0, 0, 0, 1, 1, 2], [0], [0]>} : vector<2x8x8xf32>, vector<2x8x8xf32>, vector<2x8x8xf32> -> vector<2x8x8xf32>
    %106 = vector.shape_cast %105 : vector<2x8x8xf32> to vector<16x8xf32>
    %c0_34 = arith.constant 0 : index
    %c16 = arith.constant 16 : index
    %107 = vector.load %arg4[%c0_34, %c16] : memref<16x32xf32, #tpu.memory_space<vmem>>, vector<16x8xf32>
    tpu.vector_store %arg4[%c0_34, %c16], %106 {strides = array<i32>} : memref<16x32xf32, #tpu.memory_space<vmem>>, vector<16x8xf32>,
    %108 = vector.extract_strided_slice %47 {offsets = [0, 24], sizes = [16, 8], strides = [1, 1]} : vector<16x96xf32> to vector<16x8xf32>
    %109 = vector.shape_cast %108 : vector<16x8xf32> to vector<2x8x8xf32>
    %110 = vector.extract_strided_slice %47 {offsets = [0, 56], sizes = [16, 8], strides = [1, 1]} : vector<16x96xf32> to vector<16x8xf32>
    %111 = vector.shape_cast %110 : vector<16x8xf32> to vector<2x8x8xf32>
    %112 = vector.extract_strided_slice %47 {offsets = [0, 88], sizes = [16, 8], strides = [1, 1]} : vector<16x96xf32> to vector<16x8xf32>
    %113 = vector.shape_cast %112 : vector<16x8xf32> to vector<2x8x8xf32>
    %cst_35 = arith.constant dense<0.000000e+00> : vector<2x8x8xf32>
    %114 = tpu.matmul %109, %111, %cst_35 {dimension_numbers = #tpu.dot_dimension_numbers<[2], [2], [1], [1], [0, 0, 0, 1, 1, 1], [0], [0]>} : vector<2x8x8xf32>, vector<2x8x8xf32>, vector<2x8x8xf32> -> vector<2x8x8xf32>
    %cst_36 = arith.constant 0.353553385 : f32
    %115 = vector.broadcast %cst_36 : f32 to vector<2x8x8xf32>
    %116 = arith.mulf %114, %115 : vector<2x8x8xf32>
    %117 = vector.broadcast %8 : vector<2x1x8xf32> to vector<2x8x8xf32>
    %118 = arith.addf %116, %117 : vector<2x8x8xf32>
    %119 = math.exp %118 : vector<2x8x8xf32>
    %cst_37 = arith.constant dense<0.000000e+00> : vector<2x8xf32>
    %120 = vector.multi_reduction <add>, %119, %cst_37 [2] : vector<2x8x8xf32> to vector<2x8xf32>
    %121 = vector.shape_cast %120 : vector<2x8xf32> to vector<2x8x1xf32>
    %122 = tpu.reciprocal %121 {approx = true} : vector<2x8x1xf32> -> vector<2x8x1xf32>
    %123 = vector.broadcast %122 : vector<2x8x1xf32> to vector<2x8x8xf32>
    %124 = arith.mulf %119, %123 : vector<2x8x8xf32>
    %cst_38 = arith.constant dense<0.000000e+00> : vector<2x8x8xf32>
    %125 = tpu.matmul %124, %113, %cst_38 {dimension_numbers = #tpu.dot_dimension_numbers<[2], [1], [1], [2], [0, 0, 0, 1, 1, 2], [0], [0]>} : vector<2x8x8xf32>, vector<2x8x8xf32>, vector<2x8x8xf32> -> vector<2x8x8xf32>
    %126 = vector.shape_cast %125 : vector<2x8x8xf32> to vector<16x8xf32>
    %c0_39 = arith.constant 0 : index
    %c24 = arith.constant 24 : index
    %127 = vector.load %arg4[%c0_39, %c24] : memref<16x32xf32, #tpu.memory_space<vmem>>, vector<16x8xf32>
    tpu.vector_store %arg4[%c0_39, %c24], %126 {strides = array<i32>} : memref<16x32xf32, #tpu.memory_space<vmem>>, vector<16x8xf32>,
    %c0_40 = arith.constant 0 : index
    %c0_41 = arith.constant 0 : index
    %128 = vector.load %arg4[%c0_40, %c0_41] : memref<16x32xf32, #tpu.memory_space<vmem>>, vector<16x32xf32>
    %c136 = arith.constant 136 : index
    %c0_42 = arith.constant 0 : index
    %129 = vector.load %arg2[%c136, %c0_42] : memref<544x128xf32, #tpu.memory_space<vmem>>, vector<32x32xf32>
    %cst_43 = arith.constant dense<0.000000e+00> : vector<16x32xf32>
    %130 = tpu.matmul %128, %129, %cst_43 {dimension_numbers = #tpu.dot_dimension_numbers<[1], [0], [0], [1], [0, 0, 1, 1], [], []>} : vector<16x32xf32>, vector<32x32xf32>, vector<16x32xf32> -> vector<16x32xf32>
    %c168 = arith.constant 168 : index
    %c0_44 = arith.constant 0 : index
    %131 = vector.load %arg2[%c168, %c0_44] : memref<544x128xf32, #tpu.memory_space<vmem>>, vector<1x32xf32>
    %132 = vector.broadcast %131 : vector<1x32xf32> to vector<16x32xf32>
    %133 = arith.addf %130, %132 : vector<16x32xf32>
    %134 = arith.addf %133, %42 : vector<16x32xf32>
    %c176 = arith.constant 176 : index
    %c0_45 = arith.constant 0 : index
    %135 = vector.load %arg2[%c176, %c0_45] : memref<544x128xf32, #tpu.memory_space<vmem>>, vector<1x32xf32>
    %c184 = arith.constant 184 : index
    %c0_46 = arith.constant 0 : index
    %136 = vector.load %arg2[%c184, %c0_46] : memref<544x128xf32, #tpu.memory_space<vmem>>, vector<1x32xf32>
    %cst_47 = arith.constant dense<0.000000e+00> : vector<16xf32>
    %137 = vector.multi_reduction <add>, %134, %cst_47 [1] : vector<16x32xf32> to vector<16xf32>
    %138 = vector.shape_cast %137 : vector<16xf32> to vector<16x1xf32>
    %cst_48 = arith.constant 3.200000e+01 : f32
    %139 = vector.broadcast %cst_48 : f32 to vector<16x1xf32>
    %140 = arith.divf %138, %139 : vector<16x1xf32>
    %141 = vector.broadcast %140 : vector<16x1xf32> to vector<16x32xf32>
    %142 = arith.subf %134, %141 : vector<16x32xf32>
    %143 = arith.mulf %142, %142 : vector<16x32xf32>
    %cst_49 = arith.constant dense<0.000000e+00> : vector<16xf32>
    %144 = vector.multi_reduction <add>, %143, %cst_49 [1] : vector<16x32xf32> to vector<16xf32>
    %145 = vector.shape_cast %144 : vector<16xf32> to vector<16x1xf32>
    %cst_50 = arith.constant 3.200000e+01 : f32
    %146 = vector.broadcast %cst_50 : f32 to vector<16x1xf32>
    %147 = arith.divf %145, %146 : vector<16x1xf32>
    %148 = vector.broadcast %140 : vector<16x1xf32> to vector<16x32xf32>
    %149 = arith.subf %134, %148 : vector<16x32xf32>
    %cst_51 = arith.constant 9.99999996E-13 : f32
    %150 = vector.broadcast %cst_51 : f32 to vector<16x1xf32>
    %151 = arith.addf %147, %150 : vector<16x1xf32>
    %152 = math.rsqrt %151 : vector<16x1xf32>
    %153 = vector.broadcast %152 : vector<16x1xf32> to vector<16x32xf32>
    %154 = arith.mulf %149, %153 : vector<16x32xf32>
    %155 = vector.broadcast %135 : vector<1x32xf32> to vector<16x32xf32>
    %156 = arith.mulf %154, %155 : vector<16x32xf32>
    %157 = vector.broadcast %136 : vector<1x32xf32> to vector<16x32xf32>
    %158 = arith.addf %156, %157 : vector<16x32xf32>
    %c192 = arith.constant 192 : index
    %c0_52 = arith.constant 0 : index
    %159 = vector.load %arg2[%c192, %c0_52] : memref<544x128xf32, #tpu.memory_space<vmem>>, vector<32x64xf32>
    %cst_53 = arith.constant dense<0.000000e+00> : vector<16x64xf32>
    %160 = tpu.matmul %158, %159, %cst_53 {dimension_numbers = #tpu.dot_dimension_numbers<[1], [0], [0], [1], [0, 0, 1, 1], [], []>} : vector<16x32xf32>, vector<32x64xf32>, vector<16x64xf32> -> vector<16x64xf32>
    %c224 = arith.constant 224 : index
    %c0_54 = arith.constant 0 : index
    %161 = vector.load %arg2[%c224, %c0_54] : memref<544x128xf32, #tpu.memory_space<vmem>>, vector<1x64xf32>
    %162 = vector.broadcast %161 : vector<1x64xf32> to vector<16x64xf32>
    %163 = arith.addf %160, %162 : vector<16x64xf32>
    %164 = arith.mulf %163, %163 : vector<16x64xf32>
    %165 = arith.mulf %163, %164 : vector<16x64xf32>
    %cst_55 = arith.constant 4.471500e-02 : f32
    %166 = vector.broadcast %cst_55 : f32 to vector<16x64xf32>
    %167 = arith.mulf %166, %165 : vector<16x64xf32>
    %168 = arith.addf %163, %167 : vector<16x64xf32>
    %cst_56 = arith.constant 0.797884583 : f32
    %169 = vector.broadcast %cst_56 : f32 to vector<16x64xf32>
    %170 = arith.mulf %169, %168 : vector<16x64xf32>
    %171 = math.tanh %170 : vector<16x64xf32>
    %cst_57 = arith.constant 1.000000e+00 : f32
    %172 = vector.broadcast %cst_57 : f32 to vector<16x64xf32>
    %173 = arith.addf %172, %171 : vector<16x64xf32>
    %cst_58 = arith.constant 5.000000e-01 : f32
    %174 = vector.broadcast %cst_58 : f32 to vector<16x64xf32>
    %175 = arith.mulf %174, %173 : vector<16x64xf32>
    %176 = arith.mulf %163, %175 : vector<16x64xf32>
    %c232 = arith.constant 232 : index
    %c0_59 = arith.constant 0 : index
    %177 = vector.load %arg2[%c232, %c0_59] : memref<544x128xf32, #tpu.memory_space<vmem>>, vector<64x32xf32>
    %cst_60 = arith.constant dense<0.000000e+00> : vector<16x32xf32>
    %178 = tpu.matmul %176, %177, %cst_60 {dimension_numbers = #tpu.dot_dimension_numbers<[1], [0], [0], [1], [0, 0, 1, 1], [], []>} : vector<16x64xf32>, vector<64x32xf32>, vector<16x32xf32> -> vector<16x32xf32>
    %c296 = arith.constant 296 : index
    %c0_61 = arith.constant 0 : index
    %179 = vector.load %arg2[%c296, %c0_61] : memref<544x128xf32, #tpu.memory_space<vmem>>, vector<1x32xf32>
    %180 = vector.broadcast %179 : vector<1x32xf32> to vector<16x32xf32>
    %181 = arith.addf %178, %180 : vector<16x32xf32>
    %182 = arith.addf %181, %158 : vector<16x32xf32>
    %c304 = arith.constant 304 : index
    %c0_62 = arith.constant 0 : index
    %183 = vector.load %arg2[%c304, %c0_62] : memref<544x128xf32, #tpu.memory_space<vmem>>, vector<1x32xf32>
    %c312 = arith.constant 312 : index
    %c0_63 = arith.constant 0 : index
    %184 = vector.load %arg2[%c312, %c0_63] : memref<544x128xf32, #tpu.memory_space<vmem>>, vector<1x32xf32>
    %cst_64 = arith.constant dense<0.000000e+00> : vector<16xf32>
    %185 = vector.multi_reduction <add>, %182, %cst_64 [1] : vector<16x32xf32> to vector<16xf32>
    %186 = vector.shape_cast %185 : vector<16xf32> to vector<16x1xf32>
    %cst_65 = arith.constant 3.200000e+01 : f32
    %187 = vector.broadcast %cst_65 : f32 to vector<16x1xf32>
    %188 = arith.divf %186, %187 : vector<16x1xf32>
    %189 = vector.broadcast %188 : vector<16x1xf32> to vector<16x32xf32>
    %190 = arith.subf %182, %189 : vector<16x32xf32>
    %191 = arith.mulf %190, %190 : vector<16x32xf32>
    %cst_66 = arith.constant dense<0.000000e+00> : vector<16xf32>
    %192 = vector.multi_reduction <add>, %191, %cst_66 [1] : vector<16x32xf32> to vector<16xf32>
    %193 = vector.shape_cast %192 : vector<16xf32> to vector<16x1xf32>
    %cst_67 = arith.constant 3.200000e+01 : f32
    %194 = vector.broadcast %cst_67 : f32 to vector<16x1xf32>
    %195 = arith.divf %193, %194 : vector<16x1xf32>
    %196 = vector.broadcast %188 : vector<16x1xf32> to vector<16x32xf32>
    %197 = arith.subf %182, %196 : vector<16x32xf32>
    %cst_68 = arith.constant 9.99999996E-13 : f32
    %198 = vector.broadcast %cst_68 : f32 to vector<16x1xf32>
    %199 = arith.addf %195, %198 : vector<16x1xf32>
    %200 = math.rsqrt %199 : vector<16x1xf32>
    %201 = vector.broadcast %200 : vector<16x1xf32> to vector<16x32xf32>
    %202 = arith.mulf %197, %201 : vector<16x32xf32>
    %203 = vector.broadcast %183 : vector<1x32xf32> to vector<16x32xf32>
    %204 = arith.mulf %202, %203 : vector<16x32xf32>
    %205 = vector.broadcast %184 : vector<1x32xf32> to vector<16x32xf32>
    %206 = arith.addf %204, %205 : vector<16x32xf32>
    %c320 = arith.constant 320 : index
    %c0_69 = arith.constant 0 : index
    %207 = vector.load %arg2[%c320, %c0_69] : memref<544x128xf32, #tpu.memory_space<vmem>>, vector<32x96xf32>
    %cst_70 = arith.constant dense<0.000000e+00> : vector<16x96xf32>
    %208 = tpu.matmul %206, %207, %cst_70 {dimension_numbers = #tpu.dot_dimension_numbers<[1], [0], [0], [1], [0, 0, 1, 1], [], []>} : vector<16x32xf32>, vector<32x96xf32>, vector<16x96xf32> -> vector<16x96xf32>
    %c352 = arith.constant 352 : index
    %c0_71 = arith.constant 0 : index
    %209 = vector.load %arg2[%c352, %c0_71] : memref<544x128xf32, #tpu.memory_space<vmem>>, vector<1x96xf32>
    %210 = vector.broadcast %209 : vector<1x96xf32> to vector<16x96xf32>
    %211 = arith.addf %208, %210 : vector<16x96xf32>
    %212 = vector.extract_strided_slice %211 {offsets = [0, 0], sizes = [16, 8], strides = [1, 1]} : vector<16x96xf32> to vector<16x8xf32>
    %213 = vector.shape_cast %212 : vector<16x8xf32> to vector<2x8x8xf32>
    %214 = vector.extract_strided_slice %211 {offsets = [0, 32], sizes = [16, 8], strides = [1, 1]} : vector<16x96xf32> to vector<16x8xf32>
    %215 = vector.shape_cast %214 : vector<16x8xf32> to vector<2x8x8xf32>
    %216 = vector.extract_strided_slice %211 {offsets = [0, 64], sizes = [16, 8], strides = [1, 1]} : vector<16x96xf32> to vector<16x8xf32>
    %217 = vector.shape_cast %216 : vector<16x8xf32> to vector<2x8x8xf32>
    %cst_72 = arith.constant dense<0.000000e+00> : vector<2x8x8xf32>
    %218 = tpu.matmul %213, %215, %cst_72 {dimension_numbers = #tpu.dot_dimension_numbers<[2], [2], [1], [1], [0, 0, 0, 1, 1, 1], [0], [0]>} : vector<2x8x8xf32>, vector<2x8x8xf32>, vector<2x8x8xf32> -> vector<2x8x8xf32>
    %cst_73 = arith.constant 0.353553385 : f32
    %219 = vector.broadcast %cst_73 : f32 to vector<2x8x8xf32>
    %220 = arith.mulf %218, %219 : vector<2x8x8xf32>
    %221 = vector.broadcast %8 : vector<2x1x8xf32> to vector<2x8x8xf32>
    %222 = arith.addf %220, %221 : vector<2x8x8xf32>
    %223 = math.exp %222 : vector<2x8x8xf32>
    %cst_74 = arith.constant dense<0.000000e+00> : vector<2x8xf32>
    %224 = vector.multi_reduction <add>, %223, %cst_74 [2] : vector<2x8x8xf32> to vector<2x8xf32>
    %225 = vector.shape_cast %224 : vector<2x8xf32> to vector<2x8x1xf32>
    %226 = tpu.reciprocal %225 {approx = true} : vector<2x8x1xf32> -> vector<2x8x1xf32>
    %227 = vector.broadcast %226 : vector<2x8x1xf32> to vector<2x8x8xf32>
    %228 = arith.mulf %223, %227 : vector<2x8x8xf32>
    %cst_75 = arith.constant dense<0.000000e+00> : vector<2x8x8xf32>
    %229 = tpu.matmul %228, %217, %cst_75 {dimension_numbers = #tpu.dot_dimension_numbers<[2], [1], [1], [2], [0, 0, 0, 1, 1, 2], [0], [0]>} : vector<2x8x8xf32>, vector<2x8x8xf32>, vector<2x8x8xf32> -> vector<2x8x8xf32>
    %230 = vector.shape_cast %229 : vector<2x8x8xf32> to vector<16x8xf32>
    %c0_76 = arith.constant 0 : index
    %c0_77 = arith.constant 0 : index
    %231 = vector.load %arg4[%c0_76, %c0_77] : memref<16x32xf32, #tpu.memory_space<vmem>>, vector<16x8xf32>
    tpu.vector_store %arg4[%c0_76, %c0_77], %230 {strides = array<i32>} : memref<16x32xf32, #tpu.memory_space<vmem>>, vector<16x8xf32>,
    %232 = vector.extract_strided_slice %211 {offsets = [0, 8], sizes = [16, 8], strides = [1, 1]} : vector<16x96xf32> to vector<16x8xf32>
    %233 = vector.shape_cast %232 : vector<16x8xf32> to vector<2x8x8xf32>
    %234 = vector.extract_strided_slice %211 {offsets = [0, 40], sizes = [16, 8], strides = [1, 1]} : vector<16x96xf32> to vector<16x8xf32>
    %235 = vector.shape_cast %234 : vector<16x8xf32> to vector<2x8x8xf32>
    %236 = vector.extract_strided_slice %211 {offsets = [0, 72], sizes = [16, 8], strides = [1, 1]} : vector<16x96xf32> to vector<16x8xf32>
    %237 = vector.shape_cast %236 : vector<16x8xf32> to vector<2x8x8xf32>
    %cst_78 = arith.constant dense<0.000000e+00> : vector<2x8x8xf32>
    %238 = tpu.matmul %233, %235, %cst_78 {dimension_numbers = #tpu.dot_dimension_numbers<[2], [2], [1], [1], [0, 0, 0, 1, 1, 1], [0], [0]>} : vector<2x8x8xf32>, vector<2x8x8xf32>, vector<2x8x8xf32> -> vector<2x8x8xf32>
    %cst_79 = arith.constant 0.353553385 : f32
    %239 = vector.broadcast %cst_79 : f32 to vector<2x8x8xf32>
    %240 = arith.mulf %238, %239 : vector<2x8x8xf32>
    %241 = vector.broadcast %8 : vector<2x1x8xf32> to vector<2x8x8xf32>
    %242 = arith.addf %240, %241 : vector<2x8x8xf32>
    %243 = math.exp %242 : vector<2x8x8xf32>
    %cst_80 = arith.constant dense<0.000000e+00> : vector<2x8xf32>
    %244 = vector.multi_reduction <add>, %243, %cst_80 [2] : vector<2x8x8xf32> to vector<2x8xf32>
    %245 = vector.shape_cast %244 : vector<2x8xf32> to vector<2x8x1xf32>
    %246 = tpu.reciprocal %245 {approx = true} : vector<2x8x1xf32> -> vector<2x8x1xf32>
    %247 = vector.broadcast %246 : vector<2x8x1xf32> to vector<2x8x8xf32>
    %248 = arith.mulf %243, %247 : vector<2x8x8xf32>
    %cst_81 = arith.constant dense<0.000000e+00> : vector<2x8x8xf32>
    %249 = tpu.matmul %248, %237, %cst_81 {dimension_numbers = #tpu.dot_dimension_numbers<[2], [1], [1], [2], [0, 0, 0, 1, 1, 2], [0], [0]>} : vector<2x8x8xf32>, vector<2x8x8xf32>, vector<2x8x8xf32> -> vector<2x8x8xf32>
    %250 = vector.shape_cast %249 : vector<2x8x8xf32> to vector<16x8xf32>
    %c0_82 = arith.constant 0 : index
    %c8_83 = arith.constant 8 : index
    %251 = vector.load %arg4[%c0_82, %c8_83] : memref<16x32xf32, #tpu.memory_space<vmem>>, vector<16x8xf32>
    tpu.vector_store %arg4[%c0_82, %c8_83], %250 {strides = array<i32>} : memref<16x32xf32, #tpu.memory_space<vmem>>, vector<16x8xf32>,
    %252 = vector.extract_strided_slice %211 {offsets = [0, 16], sizes = [16, 8], strides = [1, 1]} : vector<16x96xf32> to vector<16x8xf32>
    %253 = vector.shape_cast %252 : vector<16x8xf32> to vector<2x8x8xf32>
    %254 = vector.extract_strided_slice %211 {offsets = [0, 48], sizes = [16, 8], strides = [1, 1]} : vector<16x96xf32> to vector<16x8xf32>
    %255 = vector.shape_cast %254 : vector<16x8xf32> to vector<2x8x8xf32>
    %256 = vector.extract_strided_slice %211 {offsets = [0, 80], sizes = [16, 8], strides = [1, 1]} : vector<16x96xf32> to vector<16x8xf32>
    %257 = vector.shape_cast %256 : vector<16x8xf32> to vector<2x8x8xf32>
    %cst_84 = arith.constant dense<0.000000e+00> : vector<2x8x8xf32>
    %258 = tpu.matmul %253, %255, %cst_84 {dimension_numbers = #tpu.dot_dimension_numbers<[2], [2], [1], [1], [0, 0, 0, 1, 1, 1], [0], [0]>} : vector<2x8x8xf32>, vector<2x8x8xf32>, vector<2x8x8xf32> -> vector<2x8x8xf32>
    %cst_85 = arith.constant 0.353553385 : f32
    %259 = vector.broadcast %cst_85 : f32 to vector<2x8x8xf32>
    %260 = arith.mulf %258, %259 : vector<2x8x8xf32>
    %261 = vector.broadcast %8 : vector<2x1x8xf32> to vector<2x8x8xf32>
    %262 = arith.addf %260, %261 : vector<2x8x8xf32>
    %263 = math.exp %262 : vector<2x8x8xf32>
    %cst_86 = arith.constant dense<0.000000e+00> : vector<2x8xf32>
    %264 = vector.multi_reduction <add>, %263, %cst_86 [2] : vector<2x8x8xf32> to vector<2x8xf32>
    %265 = vector.shape_cast %264 : vector<2x8xf32> to vector<2x8x1xf32>
    %266 = tpu.reciprocal %265 {approx = true} : vector<2x8x1xf32> -> vector<2x8x1xf32>
    %267 = vector.broadcast %266 : vector<2x8x1xf32> to vector<2x8x8xf32>
    %268 = arith.mulf %263, %267 : vector<2x8x8xf32>
    %cst_87 = arith.constant dense<0.000000e+00> : vector<2x8x8xf32>
    %269 = tpu.matmul %268, %257, %cst_87 {dimension_numbers = #tpu.dot_dimension_numbers<[2], [1], [1], [2], [0, 0, 0, 1, 1, 2], [0], [0]>} : vector<2x8x8xf32>, vector<2x8x8xf32>, vector<2x8x8xf32> -> vector<2x8x8xf32>
    %270 = vector.shape_cast %269 : vector<2x8x8xf32> to vector<16x8xf32>
    %c0_88 = arith.constant 0 : index
    %c16_89 = arith.constant 16 : index
    %271 = vector.load %arg4[%c0_88, %c16_89] : memref<16x32xf32, #tpu.memory_space<vmem>>, vector<16x8xf32>
    tpu.vector_store %arg4[%c0_88, %c16_89], %270 {strides = array<i32>} : memref<16x32xf32, #tpu.memory_space<vmem>>, vector<16x8xf32>,
    %272 = vector.extract_strided_slice %211 {offsets = [0, 24], sizes = [16, 8], strides = [1, 1]} : vector<16x96xf32> to vector<16x8xf32>
    %273 = vector.shape_cast %272 : vector<16x8xf32> to vector<2x8x8xf32>
    %274 = vector.extract_strided_slice %211 {offsets = [0, 56], sizes = [16, 8], strides = [1, 1]} : vector<16x96xf32> to vector<16x8xf32>
    %275 = vector.shape_cast %274 : vector<16x8xf32> to vector<2x8x8xf32>
    %276 = vector.extract_strided_slice %211 {offsets = [0, 88], sizes = [16, 8], strides = [1, 1]} : vector<16x96xf32> to vector<16x8xf32>
    %277 = vector.shape_cast %276 : vector<16x8xf32> to vector<2x8x8xf32>
    %cst_90 = arith.constant dense<0.000000e+00> : vector<2x8x8xf32>
    %278 = tpu.matmul %273, %275, %cst_90 {dimension_numbers = #tpu.dot_dimension_numbers<[2], [2], [1], [1], [0, 0, 0, 1, 1, 1], [0], [0]>} : vector<2x8x8xf32>, vector<2x8x8xf32>, vector<2x8x8xf32> -> vector<2x8x8xf32>
    %cst_91 = arith.constant 0.353553385 : f32
    %279 = vector.broadcast %cst_91 : f32 to vector<2x8x8xf32>
    %280 = arith.mulf %278, %279 : vector<2x8x8xf32>
    %281 = vector.broadcast %8 : vector<2x1x8xf32> to vector<2x8x8xf32>
    %282 = arith.addf %280, %281 : vector<2x8x8xf32>
    %283 = math.exp %282 : vector<2x8x8xf32>
    %cst_92 = arith.constant dense<0.000000e+00> : vector<2x8xf32>
    %284 = vector.multi_reduction <add>, %283, %cst_92 [2] : vector<2x8x8xf32> to vector<2x8xf32>
    %285 = vector.shape_cast %284 : vector<2x8xf32> to vector<2x8x1xf32>
    %286 = tpu.reciprocal %285 {approx = true} : vector<2x8x1xf32> -> vector<2x8x1xf32>
    %287 = vector.broadcast %286 : vector<2x8x1xf32> to vector<2x8x8xf32>
    %288 = arith.mulf %283, %287 : vector<2x8x8xf32>
    %cst_93 = arith.constant dense<0.000000e+00> : vector<2x8x8xf32>
    %289 = tpu.matmul %288, %277, %cst_93 {dimension_numbers = #tpu.dot_dimension_numbers<[2], [1], [1], [2], [0, 0, 0, 1, 1, 2], [0], [0]>} : vector<2x8x8xf32>, vector<2x8x8xf32>, vector<2x8x8xf32> -> vector<2x8x8xf32>
    %290 = vector.shape_cast %289 : vector<2x8x8xf32> to vector<16x8xf32>
    %c0_94 = arith.constant 0 : index
    %c24_95 = arith.constant 24 : index
    %291 = vector.load %arg4[%c0_94, %c24_95] : memref<16x32xf32, #tpu.memory_space<vmem>>, vector<16x8xf32>
    tpu.vector_store %arg4[%c0_94, %c24_95], %290 {strides = array<i32>} : memref<16x32xf32, #tpu.memory_space<vmem>>, vector<16x8xf32>,
    %c0_96 = arith.constant 0 : index
    %c0_97 = arith.constant 0 : index
    %292 = vector.load %arg4[%c0_96, %c0_97] : memref<16x32xf32, #tpu.memory_space<vmem>>, vector<16x32xf32>
    %c360 = arith.constant 360 : index
    %c0_98 = arith.constant 0 : index
    %293 = vector.load %arg2[%c360, %c0_98] : memref<544x128xf32, #tpu.memory_space<vmem>>, vector<32x32xf32>
    %cst_99 = arith.constant dense<0.000000e+00> : vector<16x32xf32>
    %294 = tpu.matmul %292, %293, %cst_99 {dimension_numbers = #tpu.dot_dimension_numbers<[1], [0], [0], [1], [0, 0, 1, 1], [], []>} : vector<16x32xf32>, vector<32x32xf32>, vector<16x32xf32> -> vector<16x32xf32>
    %c392 = arith.constant 392 : index
    %c0_100 = arith.constant 0 : index
    %295 = vector.load %arg2[%c392, %c0_100] : memref<544x128xf32, #tpu.memory_space<vmem>>, vector<1x32xf32>
    %296 = vector.broadcast %295 : vector<1x32xf32> to vector<16x32xf32>
    %297 = arith.addf %294, %296 : vector<16x32xf32>
    %298 = arith.addf %297, %206 : vector<16x32xf32>
    %c400 = arith.constant 400 : index
    %c0_101 = arith.constant 0 : index
    %299 = vector.load %arg2[%c400, %c0_101] : memref<544x128xf32, #tpu.memory_space<vmem>>, vector<1x32xf32>
    %c408 = arith.constant 408 : index
    %c0_102 = arith.constant 0 : index
    %300 = vector.load %arg2[%c408, %c0_102] : memref<544x128xf32, #tpu.memory_space<vmem>>, vector<1x32xf32>
    %cst_103 = arith.constant dense<0.000000e+00> : vector<16xf32>
    %301 = vector.multi_reduction <add>, %298, %cst_103 [1] : vector<16x32xf32> to vector<16xf32>
    %302 = vector.shape_cast %301 : vector<16xf32> to vector<16x1xf32>
    %cst_104 = arith.constant 3.200000e+01 : f32
    %303 = vector.broadcast %cst_104 : f32 to vector<16x1xf32>
    %304 = arith.divf %302, %303 : vector<16x1xf32>
    %305 = vector.broadcast %304 : vector<16x1xf32> to vector<16x32xf32>
    %306 = arith.subf %298, %305 : vector<16x32xf32>
    %307 = arith.mulf %306, %306 : vector<16x32xf32>
    %cst_105 = arith.constant dense<0.000000e+00> : vector<16xf32>
    %308 = vector.multi_reduction <add>, %307, %cst_105 [1] : vector<16x32xf32> to vector<16xf32>
    %309 = vector.shape_cast %308 : vector<16xf32> to vector<16x1xf32>
    %cst_106 = arith.constant 3.200000e+01 : f32
    %310 = vector.broadcast %cst_106 : f32 to vector<16x1xf32>
    %311 = arith.divf %309, %310 : vector<16x1xf32>
    %312 = vector.broadcast %304 : vector<16x1xf32> to vector<16x32xf32>
    %313 = arith.subf %298, %312 : vector<16x32xf32>
    %cst_107 = arith.constant 9.99999996E-13 : f32
    %314 = vector.broadcast %cst_107 : f32 to vector<16x1xf32>
    %315 = arith.addf %311, %314 : vector<16x1xf32>
    %316 = math.rsqrt %315 : vector<16x1xf32>
    %317 = vector.broadcast %316 : vector<16x1xf32> to vector<16x32xf32>
    %318 = arith.mulf %313, %317 : vector<16x32xf32>
    %319 = vector.broadcast %299 : vector<1x32xf32> to vector<16x32xf32>
    %320 = arith.mulf %318, %319 : vector<16x32xf32>
    %321 = vector.broadcast %300 : vector<1x32xf32> to vector<16x32xf32>
    %322 = arith.addf %320, %321 : vector<16x32xf32>
    %c416 = arith.constant 416 : index
    %c0_108 = arith.constant 0 : index
    %323 = vector.load %arg2[%c416, %c0_108] : memref<544x128xf32, #tpu.memory_space<vmem>>, vector<32x64xf32>
    %cst_109 = arith.constant dense<0.000000e+00> : vector<16x64xf32>
    %324 = tpu.matmul %322, %323, %cst_109 {dimension_numbers = #tpu.dot_dimension_numbers<[1], [0], [0], [1], [0, 0, 1, 1], [], []>} : vector<16x32xf32>, vector<32x64xf32>, vector<16x64xf32> -> vector<16x64xf32>
    %c448 = arith.constant 448 : index
    %c0_110 = arith.constant 0 : index
    %325 = vector.load %arg2[%c448, %c0_110] : memref<544x128xf32, #tpu.memory_space<vmem>>, vector<1x64xf32>
    %326 = vector.broadcast %325 : vector<1x64xf32> to vector<16x64xf32>
    %327 = arith.addf %324, %326 : vector<16x64xf32>
    %328 = arith.mulf %327, %327 : vector<16x64xf32>
    %329 = arith.mulf %327, %328 : vector<16x64xf32>
    %cst_111 = arith.constant 4.471500e-02 : f32
    %330 = vector.broadcast %cst_111 : f32 to vector<16x64xf32>
    %331 = arith.mulf %330, %329 : vector<16x64xf32>
    %332 = arith.addf %327, %331 : vector<16x64xf32>
    %cst_112 = arith.constant 0.797884583 : f32
    %333 = vector.broadcast %cst_112 : f32 to vector<16x64xf32>
    %334 = arith.mulf %333, %332 : vector<16x64xf32>
    %335 = math.tanh %334 : vector<16x64xf32>
    %cst_113 = arith.constant 1.000000e+00 : f32
    %336 = vector.broadcast %cst_113 : f32 to vector<16x64xf32>
    %337 = arith.addf %336, %335 : vector<16x64xf32>
    %cst_114 = arith.constant 5.000000e-01 : f32
    %338 = vector.broadcast %cst_114 : f32 to vector<16x64xf32>
    %339 = arith.mulf %338, %337 : vector<16x64xf32>
    %340 = arith.mulf %327, %339 : vector<16x64xf32>
    %c456 = arith.constant 456 : index
    %c0_115 = arith.constant 0 : index
    %341 = vector.load %arg2[%c456, %c0_115] : memref<544x128xf32, #tpu.memory_space<vmem>>, vector<64x32xf32>
    %cst_116 = arith.constant dense<0.000000e+00> : vector<16x32xf32>
    %342 = tpu.matmul %340, %341, %cst_116 {dimension_numbers = #tpu.dot_dimension_numbers<[1], [0], [0], [1], [0, 0, 1, 1], [], []>} : vector<16x64xf32>, vector<64x32xf32>, vector<16x32xf32> -> vector<16x32xf32>
    %c520 = arith.constant 520 : index
    %c0_117 = arith.constant 0 : index
    %343 = vector.load %arg2[%c520, %c0_117] : memref<544x128xf32, #tpu.memory_space<vmem>>, vector<1x32xf32>
    %344 = vector.broadcast %343 : vector<1x32xf32> to vector<16x32xf32>
    %345 = arith.addf %342, %344 : vector<16x32xf32>
    %346 = arith.addf %345, %322 : vector<16x32xf32>
    %c528 = arith.constant 528 : index
    %c0_118 = arith.constant 0 : index
    %347 = vector.load %arg2[%c528, %c0_118] : memref<544x128xf32, #tpu.memory_space<vmem>>, vector<1x32xf32>
    %c536 = arith.constant 536 : index
    %c0_119 = arith.constant 0 : index
    %348 = vector.load %arg2[%c536, %c0_119] : memref<544x128xf32, #tpu.memory_space<vmem>>, vector<1x32xf32>
    %cst_120 = arith.constant dense<0.000000e+00> : vector<16xf32>
    %349 = vector.multi_reduction <add>, %346, %cst_120 [1] : vector<16x32xf32> to vector<16xf32>
    %350 = vector.shape_cast %349 : vector<16xf32> to vector<16x1xf32>
    %cst_121 = arith.constant 3.200000e+01 : f32
    %351 = vector.broadcast %cst_121 : f32 to vector<16x1xf32>
    %352 = arith.divf %350, %351 : vector<16x1xf32>
    %353 = vector.broadcast %352 : vector<16x1xf32> to vector<16x32xf32>
    %354 = arith.subf %346, %353 : vector<16x32xf32>
    %355 = arith.mulf %354, %354 : vector<16x32xf32>
    %cst_122 = arith.constant dense<0.000000e+00> : vector<16xf32>
    %356 = vector.multi_reduction <add>, %355, %cst_122 [1] : vector<16x32xf32> to vector<16xf32>
    %357 = vector.shape_cast %356 : vector<16xf32> to vector<16x1xf32>
    %cst_123 = arith.constant 3.200000e+01 : f32
    %358 = vector.broadcast %cst_123 : f32 to vector<16x1xf32>
    %359 = arith.divf %357, %358 : vector<16x1xf32>
    %360 = vector.broadcast %352 : vector<16x1xf32> to vector<16x32xf32>
    %361 = arith.subf %346, %360 : vector<16x32xf32>
    %cst_124 = arith.constant 9.99999996E-13 : f32
    %362 = vector.broadcast %cst_124 : f32 to vector<16x1xf32>
    %363 = arith.addf %359, %362 : vector<16x1xf32>
    %364 = math.rsqrt %363 : vector<16x1xf32>
    %365 = vector.broadcast %364 : vector<16x1xf32> to vector<16x32xf32>
    %366 = arith.mulf %361, %365 : vector<16x32xf32>
    %367 = vector.broadcast %347 : vector<1x32xf32> to vector<16x32xf32>
    %368 = arith.mulf %366, %367 : vector<16x32xf32>
    %369 = vector.broadcast %348 : vector<1x32xf32> to vector<16x32xf32>
    %370 = arith.addf %368, %369 : vector<16x32xf32>
    %371 = vector.extract_strided_slice %370 {offsets = [0, 0], sizes = [1, 32], strides = [1, 1]} : vector<16x32xf32> to vector<1x32xf32>
    %c0_125 = arith.constant 0 : index
    %c0_126 = arith.constant 0 : index
    %372 = vector.load %arg3[%c0_125, %c0_126] : memref<2x32xf32, #tpu.memory_space<vmem>>, vector<1x32xf32>
    tpu.vector_store %arg3[%c0_125, %c0_126], %371 {strides = array<i32>} : memref<2x32xf32, #tpu.memory_space<vmem>>, vector<1x32xf32>,
    %373 = vector.extract_strided_slice %370 {offsets = [8, 0], sizes = [1, 32], strides = [1, 1]} : vector<16x32xf32> to vector<1x32xf32>
    %c1 = arith.constant 1 : index
    %c0_127 = arith.constant 0 : index
    %374 = vector.load %arg3[%c1, %c0_127] : memref<2x32xf32, #tpu.memory_space<vmem>>, vector<1x32xf32>
    tpu.vector_store %arg3[%c1, %c0_127], %373 {strides = array<i32>} : memref<2x32xf32, #tpu.memory_space<vmem>>, vector<1x32xf32>,
    return
  }
}

</mosaic_0001>

<bundles_post_ra>
// kernel: forward_passage.1
= control target key start
LH: loop header
LB: loop body
LE: loop exit
PB: predicated region body
PF: predicated region fallthrough
CT: control target
= control target key end

     0   :  { %8 = vsyncpa [#allocation4], 0  ;;  %s5044_s0 = inlined_call_operand.vmem [shape: s32[16,1], index: 0, kind: input, shape index: {}]   ;;  %s5045_s1 = inlined_call_operand.vmem [shape: s32[2,1,8], index: 1, kind: input, shape index: {}]   ;;  %s5046_s2 = inlined_call_operand.hbm [shape: f32[544,128], index: 2, kind: input, shape index: {}]   ;;  %s5047_s3 = inlined_call_operand.hbm [shape: f32[2,32], index: 3, kind: output, shape index: {}]  }
   0x1   :  { %9 = vsyncpa [#allocation5], 0  ;;  %s4587_s12 = smov [#allocation3]   ;;  %s4539_s16 = scalar_lea.hbm %s5046_s2, 8704 }
   0x2   :  { %s19_s13 = sshll.u32 %s4587_s12, 4  ;;  %p4540_p0 = scmp.ne.s32.totalorder %s5046_s2, %s4539_s16  ;;  %s20_s13 = int_to_ptr.vmem [resolvable:$true] %s19_s13 }
   0x3   :  { %p4543_p1 = scmp.lt.u32.totalorder %s4539_s16, %s5046_s2 }
   0x5   :  { %p4545_p2 = pnand %p4543_p1, %p4540_p0 }
   0x7   :  { %4548 = shalt.err (!%p4545_p2)
}
   0x8   :  { %s4549_s21 = scalar_lea.vmem %s20_s13, 8704  ;;  %p4554_p4 = scmp.lt.s32.totalorder %s20_s13, %s20_s13 }
   0x9   :  { %p4550_p3 = scmp.ne.s32.totalorder %s20_s13, %s4549_s21  ;;  %p4555_p5 = scmp.lt.s32.totalorder %s4549_s21, %s4549_s21 }
   0xb   :  { %p4556_p6 = por %p4555_p5, %p4554_p4 }
   0xd   :  { %p4557_p7 = pnand %p4556_p6, %p4550_p3 }
   0xf   :  { %4560 = shalt.err (!%p4557_p7)
}
  0x10   :  { %s4588_s22 = smov 128   ;;  %s4589_s23 = smov 8  }
  0x11   :  { %25 = dma.hbm_to_vmem [thread:$0]  %s5046_s2, 8704, %s20_s13, [#allocation4], %s4588_s22, %s4588_s22, %s4589_s23  }
  0x12   :  { %4583 = dma.done.wait [#allocation4], 8704  }
  0x13   :  { %4584 = vsyncadd [#allocation4], 4294958592  ;;  %v4590_v0 = vmov 0   ;;  %v43_v1 = vld [vmem:[%s5044_s0] sm:$0xff]  ;;  %v57_v2 = vld [vmem:[#allocation3] sm:$0xff]  ;;  %v4591_v15 = vmov 0.0   ;;  %v41_v16 = vlaneseq }
  0x14   :  { %4446 = vset.pattern.permute.xlu0 %v4590_v0  ;;  %v58_v3 = vld [vmem:[#allocation3 + $0x8] sm:$0xff]  ;;  %v59_v4 = vld [vmem:[#allocation3 + $0x10] sm:$0xff]  ;;  %v60_v5 = vld [vmem:[#allocation3 + $0x18] sm:$0xff]  ;;  %vm67_vm0 = vcmask 523264   ;;  %vm151_vm3 = vcmask 261120   ;;  %vm4592_vm4 = vmmov 0  }
  0x15   :  { %46 = vperm.xlu0 %4446, %v43_v1   ;;  %v44_v6 = vld [vmem:[%s5044_s0 + $0x8] sm:$0xff]  ;;  %v4330_v7 = vpack.c.bf16 %v58_v3, %v57_v2  ;;  %v4334_v8 = vpack.c.bf16 %v60_v5, %v59_v4  ;;  %v61_v9 = vld [vmem:[#allocation3 + $0x20] sm:$0xff]  ;;  %v62_v10 = vld [vmem:[#allocation3 + $0x28] sm:$0xff]  ;;  %v42_v17 = vand.u32 127, %v41_v16  ;;  %s4593_s0 = smov 64   ;;  %s4594_s2 = smov 96  }
  0x16   :  { %v4338_v11 = vpack.c.bf16 %v62_v10, %v61_v9  ;;  %v63_v12 = vld [vmem:[#allocation3 + $0x30] sm:$0xff]  ;;  %v64_v13 = vld [vmem:[#allocation3 + $0x38] sm:$0xff]  ;;  %v65_v22 = vld [vmem:[#allocation3 + $0x40] sm:$0xff]  ;;  %s4595_s30 = smov 88   ;;  %s4596_s4 = smov 120   ;;  %vm284_vm5 = vcmask 64512  }
  0x17   :  { %4331 = vmatprep.subr.bf16.mxu0 %v4330_v7  ;;  %v4342_v14 = vpack.c.bf16 %v64_v13, %v63_v12  ;;  %v66_v24 = vld [vmem:[#allocation3 + $0x48] sm:$0xff]  ;;  %v191_v40 = vld [vmem:[#allocation3 + $0x60] sm:$0xff]  ;;  %v193_v42 = vld [vmem:[#allocation3 + $0x70] sm:$0xff]  ;;  %v441_v10 = vshrl.u32 %v41_v16, 7  ;;  %s4598_s9 = smov 80   ;;  %s4599_s10 = smov 112  }
  0x18   :  { %4333 = vmatpush3.bf16.msra.mxu0 %v4330_v7  ;;  %v192_v41 = vld [vmem:[#allocation3 + $0x68] sm:$0xff]  ;;  %v194_v44 = vld [vmem:[#allocation3 + $0x78] sm:$0xff]  ;;  %v3835_v53 = vld [vmem:[#allocation3 + $0x50] ss:$0 sm:$0xff]  ;;  %s4600_s11 = smov 48   ;;  %s4601_s12 = smov 72  }
  0x19   :  { %49 = vperm.xlu0 %4446, %v44_v6   ;;  %4335 = vmatprep.subr.bf16.mxu0 %v4334_v8  ;;  %v4346_v43 = vpack.c.bf16 %v192_v41, %v191_v40  ;;  %v4350_v45 = vpack.c.bf16 %v194_v44, %v193_v42  ;;  %v3836_v55 = vld [vmem:[#allocation3 + $0x58] ss:$0 sm:$0xff]  ;;  %v3837_v62 = vld [vmem:[#allocation3 + $0x80] ss:$0 sm:$0xff]  ;;  %v29_v7 = vld [vmem:[%s5045_s1] sm:$0x1] }
  0x1a   :  { %vm31_vm6 = vcmp.ne.s32.totalorder %v29_v7, 0  ;;  %v442_v13 = vsub.s32 0, %v441_v10  ;;  %s4602_s13 = smov 104   ;;  %s4603_s14 = smov 40   ;;  %vm954_vm8 = vcmask 130112   ;;  %vm1291_vm9 = vcmask 195712  }
  0x1b   :  { %4347 = vmatprep.subr.bf16.mxu1 %v4346_v43  ;;  %v3829_v9 = vsel %vm31_vm6, 1.0, %v4591_v15  ;;  %s4604_s15 = smov 16   ;;  %s4605_s16 = smov 24   ;;  %vm1628_vm10 = vcmask 261312   ;;  %vm3811_vm11 = vcmask 253952  }
  0x1c   :  { %4337 = vmatpush3.bf16.msra.mxu0 %v4334_v8  ;;  %4349 = vmatpush3.bf16.msra.mxu1 %v4346_v43  ;;  %v30_v8 = vld [vmem:[%s5045_s1 + $0x1] sm:$0x1]  ;;  %s4597_s1 = smov 56   ;;  %s4606_s17 = smov [#allocation6]  }
  0x1d   :  { %4339 = vmatprep.subr.bf16.mxu0 %v4338_v11  ;;  %4351 = vmatprep.subr.bf16.mxu1 %v4350_v45  ;;  %vm32_vm7 = vcmp.ne.s32.totalorder %v30_v8, 0  ;;  %s3820_s18 = sshll.u32 %s4606_s17, 4  ;;  %s3821_s18 = int_to_ptr.vmem [resolvable:$true] %s3820_s18 }
  0x1e   :  { %v3830_v12 = vsel %vm32_vm7, 1.0, %v4591_v15  ;;  %s4561_s19 = scalar_lea.vmem %s3821_s18, 32  ;;  %p4566_p9 = scmp.lt.s32.totalorder %s3821_s18, %s3821_s18 }
  0x1f   :  { %p4562_p8 = scmp.ne.s32.totalorder %s3821_s18, %s4561_s19  ;;  %p4567_p10 = scmp.lt.s32.totalorder %s4561_s19, %s4561_s19 }
  0x20   :  { %4341 = vmatpush3.bf16.msra.mxu0 %v4338_v11  ;;  %4353 = vmatpush3.bf16.msra.mxu1 %v4350_v45  ;;  %v37_v11 = vsub.f32 1.0, %v3829_v9 }
  0x21   :  { %4343 = vmatprep.subr.bf16.mxu0 %v4342_v14  ;;  %4077 = vmatprep.subr.mxu1 %v4591_v15  ;;  %p4568_p11 = por %p4567_p10, %p4566_p9 }
  0x23   :  { %p4569_p12 = pnand %p4568_p11, %p4562_p8 }
  0x24   :  { %4345 = vmatpush3.bf16.msra.mxu0 %v4342_v14  ;;  %v38_v14 = vsub.f32 1.0, %v3830_v12 }
  0x25   :  { %4087 = vmatprep.subr.mxu0 %v4591_v15 }
  0x94   :  { %v47_v18 = vpop.permute.xlu0 %46 }
  0x95   :  { %vm51_vm1 = vcmp.eq.s32.totalorder %v47_v18, %v42_v17  ;;  %v40_v18 = vmul.f32 -1e+09, %v38_v14 }
  0x96   :  { %v3831_v19 = vsel %vm51_vm1, 1.0, %v4591_v15 }
  0x97   :  { %4063 = vmatprep.mubr.msk.f32.mxu0 %vm67_vm0, %v3831_v19 }
  0x98   :  { %v50_v20 = vpop.permute.xlu0 %49 }
  0x99   :  { %vm52_vm2 = vcmp.eq.s32.totalorder %v50_v20, %v42_v17  ;;  %v39_v17 = vmul.f32 -1e+09, %v37_v11 }
  0x9a   :  { %v3832_v21 = vsel %vm52_vm2, 1.0, %v4591_v15 }
  0x9b   :  { %4064 = vmatmul.mubr.msk.f32.vlgmr.msra.gmra.mrb[0].mxu0 %vm67_vm0, %v3832_v21  ;;  %v4708_v19 = vrot.slane %v39_v17, %v442_v13 }
  0x9c   :  { %4089 = vmatprep.mubr.msk.f32.mxu0 %vm4592_vm4, %v4591_v15 }
 0x16e   :  { %v4065_v23 = vpop.f32.mrb[0].mxu0 }
 0x16f   :  { %v140_v25 = vpop.f32.mrb[1].mxu0  ;;  %v146_v27 = vadd.f32 %v4065_v23, %v66_v24  ;;  %v4710_v23 = vrot.slane %v40_v18, %v442_v13 }
 0x170   :  { %v141_v26 = vadd.f32 %v140_v25, %v65_v22 }
 0x171   :  { %v155_v29 = vsel %vm151_vm3, %v146_v27, 0.0 }
 0x172   :  { %v152_v28 = vsel %vm151_vm3, %v141_v26, 0.0 }
 0x173   :  { %153 = vadd.xlane.f32.xlu1 %v152_v28 }
 0x177   :  { %156 = vadd.xlane.f32.xlu1 %v155_v29 }
 0x200   :  { %v154_v30 = vpop.xlane.xlu1 %153 }
 0x201   :  { %v159_v31 = vmul.f32 0.03125, %v154_v30 }
 0x203   :  { %v161_v32 = vsub.f32 %v141_v26, %v159_v31 }
 0x204   :  { %v157_v33 = vpop.xlane.xlu1 %156 }
 0x205   :  { %v160_v34 = vmul.f32 0.03125, %v157_v33  ;;  %v163_v35 = vmul.f32 %v161_v32, %v161_v32 }
 0x207   :  { %v162_v36 = vsub.f32 %v146_v27, %v160_v34  ;;  %v165_v37 = vsel %vm151_vm3, %v163_v35, 0.0 }
 0x208   :  { %166 = vadd.xlane.f32.xlu0 %v165_v37 }
 0x209   :  { %v164_v38 = vmul.f32 %v162_v36, %v162_v36 }
 0x20b   :  { %v168_v39 = vsel %vm151_vm3, %v164_v38, 0.0 }
 0x20c   :  { %169 = vadd.xlane.f32.xlu1 %v168_v39 }
 0x295   :  { %v167_v46 = vpop.xlane.xlu0 %166 }
 0x296   :  { %v171_v47 = vmul.f32 0.03125, %v167_v46 }
 0x298   :  { %v173_v48 = vadd.f32 1e-12, %v171_v47 }
 0x299   :  { %v170_v49 = vpop.xlane.xlu1 %169 }
 0x29a   :  { %4447 = vrsqrt.f32 %v173_v48  ;;  %v172_v50 = vmul.f32 0.03125, %v170_v49 }
 0x29c   :  { %v174_v51 = vadd.f32 1e-12, %v172_v50 }
 0x29e   :  { %4449 = vrsqrt.f32 %v174_v51 }
 0x2a4   :  { %v4448_v52 = vpop.eup %4447 }
 0x2a5   :  { %v177_v54 = vmul.f32 %v4448_v52, %v161_v32 }
 0x2a7   :  { %v183_v56 = vmul.f32 %v3835_v53, %v177_v54 }
 0x2a8   :  { %v4450_v57 = vpop.eup %4449 }
 0x2a9   :  { %v178_v58 = vmul.f32 %v4450_v57, %v162_v36  ;;  %v4657_v59 = vadd.f32 %v3836_v55, %v183_v56 }
 0x2ab   :  { %v184_v60 = vmul.f32 %v3835_v53, %v178_v58  ;;  %4074 = vmatprep.mubr.msk.f32.mxu1 %vm151_vm3, %v4657_v59 }
 0x2ad   :  { %v4661_v61 = vadd.f32 %v3836_v55, %v184_v60 }
 0x2af   :  { %4075 = vmatmul.mubr.msk.f32.vlgmr.msra.gmra.mrb[0].mxu1 %vm151_vm3, %v4661_v61 }
 0x2b0   :  { %4079 = vmatprep.mubr.msk.f32.mxu1 %vm4592_vm4, %v4591_v15 }
 0x382   :  { %v4076_v63 = vpop.f32.mrb[0].mxu1 }
 0x383   :  { %v4669_v0 = vadd.f32 %v4076_v63, %v3837_v62  ;;  %v272_v1 = vpop.f32.mrb[1].mxu1 }
 0x384   :  { %v4671_v2 = vadd.f32 %v3837_v62, %v272_v1 }
 0x385   :  { %542 = vrot.lane.b32.xlu0 %v4669_v0, %s4593_s0 }
 0x386   :  { %282 = vrot.lane.b32.xlu1 %v4671_v2, %s4594_s2 }
 0x389   :  { %466 = vrot.lane.b32.xlu0 %v4671_v2, %s4593_s0 }
 0x38a   :  { %360 = vrot.lane.b32.xlu1 %v4669_v0, %s4594_s2 }
 0x38d   :  { %622 = vrot.lane.b32.xlu0 %v4671_v2, %s4595_s30 }
 0x391   :  { %620 = vrot.lane.b32.xlu0 %v4671_v2, %s4596_s4 }
 0x3f7   :  { %v543_v3 = vpop.permute.xlu0 %542 }
 0x3f8   :  { %v283_v4 = vpop.permute.xlu1 %282 }
 0x3f9   :  { %4078 = vmatpush3.xpose.msk.msra.mxu1 %vm284_vm5, %v283_v4 }
 0x3fa   :  { %4082 = vmatprep.subr.mxu1 %v4591_v15 }
 0x3fb   :  { %v467_v5 = vpop.permute.xlu0 %466 }
 0x3fc   :  { %4080 = vmatmul.mubr.msk.f32.vlgmr.msra.gmra.mrb[2].mxu1 %vm284_vm5, %v4671_v2  ;;  %4088 = vmatpush3.msra.mxu0 %v467_v5  ;;  %v361_v6 = vpop.permute.xlu1 %360 }
 0x3fd   :  { %4083 = vmatpush3.xpose.msk.msra.mxu1 %vm284_vm5, %v361_v6  ;;  %4084 = vmatprep.mubr.msk.f32.mxu1 %vm4592_vm4, %v4591_v15 }
 0x3fe   :  { %4092 = vmatprep.subr.mxu1 %v4591_v15  ;;  %4097 = vmatprep.subr.mxu0 %v4591_v15 }
 0x3ff   :  { %v623_v34 = vpop.permute.xlu0 %622 }
 0x400   :  { %4085 = vmatmul.mubr.msk.f32.vlgmr.msra.gmra.mrb[4].mxu1 %vm284_vm5, %v4669_v0 }
 0x401   :  { %4093 = vmatpush3.msra.mxu1 %v543_v3  ;;  %4094 = vmatprep.mubr.msk.f32.mxu1 %vm4592_vm4, %v4591_v15 }
 0x402   :  { %4102 = vmatprep.subr.mxu1 %v4591_v15 }
 0x403   :  { %v621_v35 = vpop.permute.xlu0 %620 }
 0x4cf   :  { %v355_v20 = vpop.f32.mrb[2].mxu1 }
 0x4d0   :  { %v436_v21 = vmul.f32 0.35355338, %v355_v20  ;;  %v4081_v22 = vpop.f32.mrb[3].mxu1 }
 0x4d2   :  { %v450_v24 = vadd.f32 %v4708_v19, %v436_v21 }
 0x4d3   :  { %v432_v25 = vpop.f32.mrb[4].mxu1 }
 0x4d4   :  { %v452_v26 = vmul.f32 1.442695, %v450_v24  ;;  %v437_v27 = vmul.f32 0.35355338, %v432_v25  ;;  %v4086_v16 = vpop.f32.mrb[5].mxu1 }
 0x4d6   :  { %4451 = vpow2.f32 %v452_v26  ;;  %v451_v28 = vadd.f32 %v4710_v23, %v437_v27 }
 0x4d8   :  { %v454_v29 = vmul.f32 1.442695, %v451_v28 }
 0x4da   :  { %4453 = vpow2.f32 %v454_v29 }
 0x4e0   :  { %v4452_v30 = vpop.eup %4451 }
 0x4e1   :  { %v456_v31 = vsel %vm284_vm5, %v4452_v30, 0.0 }
 0x4e2   :  { %457 = vadd.xlane.f32.xlu1 %v456_v31 }
 0x4e4   :  { %v4454_v32 = vpop.eup %4453 }
 0x4e5   :  { %v459_v33 = vsel %vm284_vm5, %v4454_v32, 0.0 }
 0x4e6   :  { %460 = vadd.xlane.f32.xlu0 %v459_v33 }
 0x4f3   :  { %700 = vrot.lane.b32.xlu1 %v4669_v0, %s4595_s30 }
 0x4f7   :  { %870 = vrot.lane.b32.xlu1 %v4669_v0, %s4597_s1 }
 0x4fc   :  { %698 = vrot.lane.b32.xlu0 %v4669_v0, %s4596_s4 }
 0x500   :  { %794 = vrot.lane.b32.xlu0 %v4671_v2, %s4597_s1 }
 0x504   :  { %959 = vrot.lane.b32.xlu0 %v4671_v2, %s4598_s9 }
 0x56f   :  { %v458_v36 = vpop.xlane.xlu1 %457 }
 0x570   :  { %4455 = vrcp.f32 %v458_v36 }
 0x573   :  { %v461_v37 = vpop.xlane.xlu0 %460  ;;  %v701_v43 = vpop.permute.xlu1 %700 }
 0x574   :  { %4457 = vrcp.f32 %v461_v37 }
 0x577   :  { %v699_v40 = vpop.permute.xlu0 %698  ;;  %v871_v45 = vpop.permute.xlu1 %870 }
 0x57a   :  { %v4456_v38 = vpop.eup %4455 }
 0x57b   :  { %v464_v39 = vmul.f32 %v4456_v38, %v4452_v30  ;;  %v795_v44 = vpop.permute.xlu0 %794 }
 0x57d   :  { %4090 = vmatmul.mubr.msk.f32.vlgmr.msra.gmra.mrb[2].mxu0 %vm284_vm5, %v464_v39 }
 0x57e   :  { %v4458_v41 = vpop.eup %4457  ;;  %4098 = vmatpush3.xpose.msk.msra.mxu0 %vm284_vm5, %v623_v34  ;;  %4099 = vmatprep.mubr.msk.f32.mxu0 %vm4592_vm4, %v4591_v15 }
 0x57f   :  { %v465_v42 = vmul.f32 %v4458_v41, %v4454_v32  ;;  %4107 = vmatprep.subr.mxu0 %v4591_v15  ;;  %v960_v4 = vpop.permute.xlu0 %959 }
 0x581   :  { %4095 = vmatmul.mubr.msk.f32.vlgmr.msra.gmra.mrb[6].mxu1 %vm284_vm5, %v465_v42  ;;  %4100 = vmatmul.mubr.msk.f32.vlgmr.msra.gmra.mrb[4].mxu0 %vm284_vm5, %v621_v35 }
 0x582   :  { %4103 = vmatpush3.xpose.msk.msra.mxu1 %vm284_vm5, %v701_v43  ;;  %4108 = vmatpush3.msra.mxu0 %v795_v44 }
 0x583   :  { %4104 = vmatprep.mubr.msk.f32.mxu1 %vm4592_vm4, %v4591_v15  ;;  %4112 = vmatprep.subr.mxu1 %v4591_v15 }
 0x584   :  { %4109 = vmatprep.mubr.msk.f32.mxu0 %vm4592_vm4, %v4591_v15  ;;  %4117 = vmatprep.subr.mxu0 %v4591_v15 }
 0x585   :  { %4105 = vmatmul.mubr.msk.f32.vlgmr.msra.gmra.mrb[8].mxu1 %vm284_vm5, %v699_v40 }
 0x586   :  { %4113 = vmatpush3.msra.mxu1 %v871_v45  ;;  %4114 = vmatprep.mubr.msk.f32.mxu1 %vm4592_vm4, %v4591_v15 }
 0x587   :  { %4122 = vmatprep.subr.mxu1 %v4591_v15 }
 0x650   :  { %v538_v46 = vpop.f32.mrb[2].mxu0 }
 0x651   :  { %618 = vst.msk [vmem:[#allocation2] sm:$0xff] %vm284_vm5, %v538_v46  ;;  %v4091_v47 = vpop.f32.mrb[3].mxu0 }
 0x654   :  { %v614_v48 = vpop.f32.mrb[6].mxu1  ;;  %v694_v49 = vpop.f32.mrb[4].mxu0 }
 0x655   :  { %619 = vst.msk [vmem:[#allocation2 + $0x8] sm:$0xff] %vm284_vm5, %v614_v48  ;;  %v776_v50 = vmul.f32 0.35355338, %v694_v49  ;;  %v4096_v51 = vpop.f32.mrb[7].mxu1  ;;  %v4101_v52 = vpop.f32.mrb[5].mxu0 }
 0x657   :  { %v778_v53 = vadd.f32 %v776_v50, %v4708_v19 }
 0x658   :  { %v772_v54 = vpop.f32.mrb[8].mxu1 }
 0x659   :  { %v780_v55 = vmul.f32 1.442695, %v778_v53  ;;  %v777_v56 = vmul.f32 0.35355338, %v772_v54  ;;  %v4106_v57 = vpop.f32.mrb[9].mxu1 }
 0x65b   :  { %4459 = vpow2.f32 %v780_v55  ;;  %v779_v58 = vadd.f32 %v777_v56, %v4710_v23 }
 0x65d   :  { %v782_v60 = vmul.f32 1.442695, %v779_v58 }
 0x65f   :  { %4461 = vpow2.f32 %v782_v60 }
 0x665   :  { %v4460_v62 = vpop.eup %4459 }
 0x666   :  { %v784_v63 = vsel %vm284_vm5, %v4460_v62, 0.0 }
 0x667   :  { %785 = vadd.xlane.f32.xlu0 %v784_v63 }
 0x669   :  { %v4462_v1 = vpop.eup %4461 }
 0x66a   :  { %v787_v3 = vsel %vm284_vm5, %v4462_v1, 0.0 }
 0x66b   :  { %788 = vadd.xlane.f32.xlu1 %v787_v3 }
 0x67c   :  { %957 = vrot.lane.b32.xlu1 %v4671_v2, %s4599_s10 }
 0x67d   :  { %1037 = vrot.lane.b32.xlu0 %v4669_v0, %s4598_s9 }
 0x680   :  { %1207 = vrot.lane.b32.xlu1 %v4669_v0, %s4600_s11 }
 0x681   :  { %1035 = vrot.lane.b32.xlu0 %v4669_v0, %s4599_s10 }
 0x684   :  { %1296 = vrot.lane.b32.xlu1 %v4671_v2, %s4601_s12 }
 0x685   :  { %1131 = vrot.lane.b32.xlu0 %v4671_v2, %s4600_s11 }
 0x689   :  { %1374 = vrot.lane.b32.xlu0 %v4669_v0, %s4601_s12 }
 0x6f4   :  { %v786_v5 = vpop.xlane.xlu0 %785 }
 0x6f5   :  { %4463 = vrcp.f32 %v786_v5 }
 0x6f8   :  { %v789_v6 = vpop.xlane.xlu1 %788  ;;  %v1038_v7 = vpop.permute.xlu0 %1037 }
 0x6f9   :  { %4465 = vrcp.f32 %v789_v6 }
 0x6fc   :  { %v1036_v10 = vpop.permute.xlu0 %1035  ;;  %v958_v13 = vpop.permute.xlu1 %957 }
 0x6ff   :  { %v4464_v8 = vpop.eup %4463 }
 0x700   :  { %v792_v9 = vmul.f32 %v4464_v8, %v4460_v62  ;;  %v1132_v14 = vpop.permute.xlu0 %1131  ;;  %v1208_v17 = vpop.permute.xlu1 %1207 }
 0x702   :  { %4110 = vmatmul.mubr.msk.f32.vlgmr.msra.gmra.mrb[6].mxu0 %vm284_vm5, %v792_v9 }
 0x703   :  { %v4466_v11 = vpop.eup %4465  ;;  %4118 = vmatpush3.xpose.msk.msra.mxu0 %vm284_vm5, %v960_v4  ;;  %4119 = vmatprep.mubr.msk.f32.mxu0 %vm4592_vm4, %v4591_v15 }
 0x704   :  { %v793_v12 = vmul.f32 %v4466_v11, %v4462_v1  ;;  %4127 = vmatprep.subr.mxu0 %v4591_v15  ;;  %v1297_v37 = vpop.permute.xlu1 %1296  ;;  %v1375_v38 = vpop.permute.xlu0 %1374 }
 0x706   :  { %4115 = vmatmul.mubr.msk.f32.vlgmr.msra.gmra.mrb[10].mxu1 %vm284_vm5, %v793_v12  ;;  %4120 = vmatmul.mubr.msk.f32.vlgmr.msra.gmra.mrb[8].mxu0 %vm284_vm5, %v958_v13 }
 0x707   :  { %4123 = vmatpush3.xpose.msk.msra.mxu1 %vm284_vm5, %v1038_v7  ;;  %4128 = vmatpush3.msra.mxu0 %v1132_v14 }
 0x708   :  { %4124 = vmatprep.mubr.msk.f32.mxu1 %vm4592_vm4, %v4591_v15  ;;  %4132 = vmatprep.subr.mxu1 %v4591_v15 }
 0x709   :  { %4129 = vmatprep.mubr.msk.f32.mxu0 %vm4592_vm4, %v4591_v15  ;;  %4137 = vmatprep.subr.mxu0 %v4591_v15 }
 0x70a   :  { %4125 = vmatmul.mubr.msk.f32.vlgmr.msra.gmra.mrb[12].mxu1 %vm284_vm5, %v1036_v10 }
 0x70b   :  { %4133 = vmatpush3.msra.mxu1 %v1208_v17  ;;  %4134 = vmatprep.mubr.msk.f32.mxu1 %vm4592_vm4, %v4591_v15  ;;  %v1633_v17 = vld [vmem:[#allocation3 + $0x88] sm:$0xff] }
 0x70c   :  { %4142 = vmatprep.subr.mxu1 %v4591_v15 }
 0x7d5   :  { %v4782_v18 = vpop.f32.mrb[6].mxu0 }
 0x7d6   :  { %v4111_v20 = vpop.f32.mrb[7].mxu0 }
 0x7d9   :  { %v4784_v21 = vpop.f32.mrb[10].mxu1  ;;  %v1031_v22 = vpop.f32.mrb[8].mxu0 }
 0x7da   :  { %v1113_v24 = vmul.f32 0.35355338, %v1031_v22  ;;  %v4116_v25 = vpop.f32.mrb[11].mxu1  ;;  %v4121_v26 = vpop.f32.mrb[9].mxu0  ;;  %v1636_v22 = vld [vmem:[#allocation3 + $0xa0] sm:$0xff] }
 0x7dc   :  { %v1115_v27 = vadd.f32 %v1113_v24, %v4708_v19 }
 0x7dd   :  { %v1109_v16 = vpop.f32.mrb[12].mxu1 }
 0x7de   :  { %v1117_v28 = vmul.f32 1.442695, %v1115_v27  ;;  %v1114_v29 = vmul.f32 0.35355338, %v1109_v16  ;;  %v4126_v30 = vpop.f32.mrb[13].mxu1 }
 0x7e0   :  { %4467 = vpow2.f32 %v1117_v28  ;;  %v1116_v31 = vadd.f32 %v1114_v29, %v4710_v23 }
 0x7e2   :  { %v1119_v32 = vmul.f32 1.442695, %v1116_v31 }
 0x7e4   :  { %4469 = vpow2.f32 %v1119_v32  ;;  %v3864_v32 = vld [vmem:[#allocation3 + $0xa8] ss:$0 sm:$0xff] }
 0x7ea   :  { %v4468_v33 = vpop.eup %4467 }
 0x7eb   :  { %v1121_v34 = vsel %vm284_vm5, %v4468_v33, 0.0 }
 0x7ec   :  { %1122 = vadd.xlane.f32.xlu1 %v1121_v34 }
 0x7ee   :  { %v4470_v35 = vpop.eup %4469 }
 0x7ef   :  { %v1124_v36 = vsel %vm284_vm5, %v4470_v35, 0.0 }
 0x7f0   :  { %1125 = vadd.xlane.f32.xlu0 %v1124_v36 }
 0x7fd   :  { %1294 = vrot.lane.b32.xlu1 %v4671_v2, %s4602_s13 }
 0x806   :  { %1372 = vrot.lane.b32.xlu0 %v4669_v0, %s4602_s13 }
 0x879   :  { %v1123_v39 = vpop.xlane.xlu1 %1122 }
 0x87a   :  { %4471 = vrcp.f32 %v1123_v39 }
 0x87d   :  { %v1126_v40 = vpop.xlane.xlu0 %1125  ;;  %v1295_v45 = vpop.permute.xlu1 %1294 }
 0x87e   :  { %4473 = vrcp.f32 %v1126_v40 }
 0x881   :  { %v1373_v46 = vpop.permute.xlu0 %1372 }
 0x884   :  { %v4472_v41 = vpop.eup %4471 }
 0x885   :  { %v1129_v42 = vmul.f32 %v4472_v41, %v4468_v33 }
 0x887   :  { %4130 = vmatmul.mubr.msk.f32.vlgmr.msra.gmra.mrb[10].mxu0 %vm284_vm5, %v1129_v42 }
 0x888   :  { %v4474_v43 = vpop.eup %4473  ;;  %4138 = vmatpush3.xpose.msk.msra.mxu0 %vm284_vm5, %v1297_v37  ;;  %4139 = vmatprep.mubr.msk.f32.mxu0 %vm4592_vm4, %v4591_v15 }
 0x889   :  { %v1130_v44 = vmul.f32 %v4474_v43, %v4470_v35  ;;  %4147 = vmatprep.subr.mxu0 %v4591_v15 }
 0x88b   :  { %4135 = vmatmul.mubr.msk.f32.vlgmr.msra.gmra.mrb[14].mxu1 %vm284_vm5, %v1130_v44  ;;  %4140 = vmatmul.mubr.msk.f32.vlgmr.msra.gmra.mrb[12].mxu0 %vm284_vm5, %v1295_v45 }
 0x88c   :  { %4143 = vmatpush3.xpose.msk.msra.mxu1 %vm284_vm5, %v1375_v38  ;;  %4144 = vmatprep.mubr.msk.f32.mxu1 %vm4592_vm4, %v4591_v15 }
 0x88d   :  { %4152 = vmatprep.subr.mxu1 %v4591_v15  ;;  %4149 = vmatprep.mubr.msk.f32.mxu0 %vm4592_vm4, %v4591_v15 }
 0x88f   :  { %4145 = vmatmul.mubr.msk.f32.vlgmr.msra.gmra.mrb[16].mxu1 %vm284_vm5, %v1373_v46 }
 0x890   :  { %4154 = vmatprep.mubr.msk.f32.mxu1 %vm4592_vm4, %v4591_v15 }
 0x95a   :  { %v1203_v47 = vpop.f32.mrb[10].mxu0 }
 0x95b   :  { %v4131_v48 = vpop.f32.mrb[11].mxu0 }
 0x95e   :  { %v1279_v49 = vpop.f32.mrb[14].mxu1  ;;  %v1368_v50 = vpop.f32.mrb[12].mxu0 }
 0x95f   :  { %v1450_v51 = vmul.f32 0.35355338, %v1368_v50  ;;  %v4136_v52 = vpop.f32.mrb[15].mxu1  ;;  %v4141_v53 = vpop.f32.mrb[13].mxu0  ;;  %v1766_v50 = vld [vmem:[#allocation3 + $0xc8] sm:$0xff] }
 0x960   :  { %v1767_v52 = vld [vmem:[#allocation3 + $0xd0] sm:$0xff]  ;;  %v1768_v53 = vld [vmem:[#allocation3 + $0xd8] sm:$0xff] }
 0x961   :  { %v1452_v54 = vadd.f32 %v1450_v51, %v4708_v19 }
 0x962   :  { %v1446_v55 = vpop.f32.mrb[16].mxu1 }
 0x963   :  { %v1454_v56 = vmul.f32 1.442695, %v1452_v54  ;;  %v1451_v57 = vmul.f32 0.35355338, %v1446_v55  ;;  %v4146_v58 = vpop.f32.mrb[17].mxu1  ;;  %v4366_v54 = vpack.c.bf16 %v1768_v53, %v1767_v52 }
 0x965   :  { %4475 = vpow2.f32 %v1454_v56  ;;  %v1453_v60 = vadd.f32 %v1451_v57, %v4710_v23 }
 0x967   :  { %v1456_v62 = vmul.f32 1.442695, %v1453_v60 }
 0x969   :  { %4477 = vpow2.f32 %v1456_v62 }
 0x96f   :  { %v4476_v63 = vpop.eup %4475 }
 0x970   :  { %v1458_v1 = vsel %vm284_vm5, %v4476_v63, 0.0 }
 0x971   :  { %1459 = vadd.xlane.f32.xlu1 %v1458_v1  ;;  %v3867_v1 = vld [vmem:[#allocation3 + $0xb0] ss:$0 sm:$0xff] }
 0x973   :  { %v4478_v3 = vpop.eup %4477 }
 0x974   :  { %v1461_v4 = vsel %vm284_vm5, %v4478_v3, 0.0 }
 0x975   :  { %1462 = vadd.xlane.f32.xlu0 %v1461_v4 }
 0x982   :  { %1544 = vrot.lane.b32.xlu1 %v4669_v0, %s4603_s14 }
 0x986   :  { %948 = vrot.lane.b32.xlu1 %v4782_v18, %s4589_s23  ;;  %v1634_v18 = vld [vmem:[#allocation3 + $0x90] sm:$0xff] }
 0x987   :  { %v4354_v20 = vpack.c.bf16 %v1634_v18, %v1633_v17  ;;  %v1877_v17 = vld [vmem:[#allocation3 + $0x108] sm:$0xff]  ;;  %v1878_v18 = vld [vmem:[#allocation3 + $0x110] sm:$0xff] }
 0x98a   :  { %1285 = vrot.lane.b32.xlu1 %v1203_v47, %s4604_s15 }
 0x98b   :  { %1468 = vrot.lane.b32.xlu0 %v4671_v2, %s4603_s14 }
 0x98f   :  { %950 = vrot.lane.b32.xlu0 %v4784_v21, %s4589_s23  ;;  %v1635_v21 = vld [vmem:[#allocation3 + $0x98] sm:$0xff] }
 0x990   :  { %v4358_v24 = vpack.c.bf16 %v1636_v22, %v1635_v21  ;;  %v1879_v21 = vld [vmem:[#allocation3 + $0x118] sm:$0xff]  ;;  %v1880_v22 = vld [vmem:[#allocation3 + $0x120] sm:$0xff] }
 0x993   :  { %1287 = vrot.lane.b32.xlu0 %v1279_v49, %s4604_s15 }
 0x9fe   :  { %v1460_v5 = vpop.xlane.xlu1 %1459 }
 0x9ff   :  { %4479 = vrcp.f32 %v1460_v5 }
 0xa02   :  { %v1463_v6 = vpop.xlane.xlu0 %1462  ;;  %v1545_v7 = vpop.permute.xlu1 %1544 }
 0xa03   :  { %4481 = vrcp.f32 %v1463_v6  ;;  %4153 = vmatpush3.msra.mxu1 %v1545_v7  ;;  %v3868_v6 = vld [vmem:[#allocation3 + $0xb8] ss:$0 sm:$0xff] }
 0xa04   :  { %4355 = vmatprep.subr.bf16.mxu1 %v4354_v20 }
 0xa06   :  { %v1469_v0 = vpop.permute.xlu0 %1468  ;;  %v949_v8 = vpop.permute.xlu1 %948 }
 0xa07   :  { %955 = vst.msk [vmem:[#allocation2] sm:$0xff] %vm954_vm8, %v949_v8  ;;  %4148 = vmatpush3.msra.mxu0 %v1469_v0 }
 0xa09   :  { %v4480_v9 = vpop.eup %4479 }
 0xa0a   :  { %v1466_v2 = vmul.f32 %v4480_v9, %v4476_v63  ;;  %v951_v10 = vpop.permute.xlu0 %950  ;;  %v1286_v11 = vpop.permute.xlu1 %1285 }
 0xa0b   :  { %956 = vst.msk [vmem:[#allocation2 + $0x8] sm:$0xff] %vm954_vm8, %v951_v10  ;;  %v1874_v10 = vld [vmem:[#allocation3 + $0xf0] sm:$0xff] }
 0xa0c   :  { %1292 = vst.msk [vmem:[#allocation2] sm:$0xff] %vm1291_vm9, %v1286_v11  ;;  %4150 = vmatmul.mubr.msk.f32.vlgmr.msra.gmra.mrb[14].mxu0 %vm284_vm5, %v1466_v2  ;;  %v1873_v2 = vld [vmem:[#allocation3 + $0xe8] sm:$0xff] }
 0xa0d   :  { %v4482_v12 = vpop.eup %4481  ;;  %v4370_v11 = vpack.c.bf16 %v1874_v10, %v1873_v2 }
 0xa0e   :  { %v1467_v13 = vmul.f32 %v4482_v12, %v4478_v3  ;;  %v1288_v14 = vpop.permute.xlu0 %1287  ;;  %v1875_v12 = vld [vmem:[#allocation3 + $0xf8] sm:$0xff] }
 0xa0f   :  { %1293 = vst.msk [vmem:[#allocation2 + $0x8] sm:$0xff] %vm1291_vm9, %v1288_v14  ;;  %4371 = vmatprep.subr.bf16.mxu0 %v4370_v11 }
 0xa10   :  { %4155 = vmatmul.mubr.msk.f32.vlgmr.msra.gmra.mrb[18].mxu1 %vm284_vm5, %v1467_v13  ;;  %4373 = vmatpush3.bf16.msra.mxu0 %v4370_v11  ;;  %v1876_v13 = vld [vmem:[#allocation3 + $0x100] sm:$0xff] }
 0xa11   :  { %4357 = vmatpush3.bf16.msra.mxu1 %v4354_v20  ;;  %v4374_v14 = vpack.c.bf16 %v1876_v13, %v1875_v12  ;;  %v4378_v20 = vpack.c.bf16 %v1878_v18, %v1877_v17  ;;  %v3875_v17 = vld [vmem:[#allocation3 + $0x130] ss:$0 sm:$0xff] }
 0xa12   :  { %4359 = vmatprep.subr.bf16.mxu1 %v4358_v24 }
 0xa13   :  { %4375 = vmatprep.subr.bf16.mxu0 %v4374_v14 }
 0xa14   :  { %4377 = vmatpush3.bf16.msra.mxu0 %v4374_v14 }
 0xa15   :  { %4361 = vmatpush3.bf16.msra.mxu1 %v4358_v24  ;;  %4379 = vmatprep.subr.bf16.mxu0 %v4378_v20  ;;  %v4382_v24 = vpack.c.bf16 %v1880_v22, %v1879_v21  ;;  %v3876_v22 = vld [vmem:[#allocation3 + $0x138] ss:$0 sm:$0xff] }
 0xa18   :  { %4381 = vmatpush3.bf16.msra.mxu0 %v4378_v20 }
 0xa19   :  { %4383 = vmatprep.subr.bf16.mxu0 %v4382_v24 }
 0xa1c   :  { %4385 = vmatpush3.bf16.msra.mxu0 %v4382_v24 }
 0xa1d   :  { %4219 = vmatprep.subr.mxu0 %v4591_v15 }
 0xadf   :  { %v1540_v25 = vpop.f32.mrb[14].mxu0 }
 0xae0   :  { %1622 = vrot.lane.b32.xlu1 %v1540_v25, %s4605_s16  ;;  %v4151_v26 = vpop.f32.mrb[15].mxu0  ;;  %v3869_v25 = vld [vmem:[#allocation3 + $0xe0] ss:$0 sm:$0xff] }
 0xae3   :  { %v1616_v27 = vpop.f32.mrb[18].mxu1 }
 0xae4   :  { %1624 = vrot.lane.b32.xlu0 %v1616_v27, %s4605_s16  ;;  %v4156_v16 = vpop.f32.mrb[19].mxu1 }
 0xb52   :  { %v1623_v28 = vpop.permute.xlu1 %1622 }
 0xb53   :  { %1629 = vst.msk [vmem:[#allocation2] sm:$0xff] %vm1628_vm10, %v1623_v28 }
 0xb56   :  { %v1625_v29 = vpop.permute.xlu0 %1624 }
 0xb57   :  { %1630 = vst.msk [vmem:[#allocation2 + $0x8] sm:$0xff] %vm1628_vm10, %v1625_v29 }
 0xb5a   :  { %v1631_v30 = vld [vmem:[#allocation2] sm:$0xff] }
 0xb5b   :  { %4165 = vmatprep.mubr.msk.f32.mxu1 %vm151_vm3, %v1631_v30 }
 0xb5e   :  { %v1632_v31 = vld [vmem:[#allocation2 + $0x8] sm:$0xff] }
 0xb5f   :  { %4166 = vmatmul.mubr.msk.f32.vlgmr.msra.gmra.mrb[20].mxu1 %vm151_vm3, %v1632_v31 }
 0xc32   :  { %v4167_v33 = vpop.f32.mrb[20].mxu1 }
 0xc33   :  { %v1720_v34 = vadd.f32 %v4167_v33, %v3864_v32  ;;  %v1714_v35 = vpop.f32.mrb[21].mxu1 }
 0xc34   :  { %v1715_v36 = vadd.f32 %v3864_v32, %v1714_v35 }
 0xc35   :  { %v1724_v37 = vadd.f32 %v1720_v34, %v4661_v61 }
 0xc36   :  { %v1723_v38 = vadd.f32 %v1715_v36, %v4657_v59  ;;  %v1765_v59 = vld [vmem:[#allocation3 + $0xc0] sm:$0xff] }
 0xc37   :  { %v1730_v39 = vsel %vm151_vm3, %v1724_v37, 0.0  ;;  %v4362_v51 = vpack.c.bf16 %v1766_v50, %v1765_v59 }
 0xc38   :  { %1731 = vadd.xlane.f32.xlu0 %v1730_v39  ;;  %v1727_v40 = vsel %vm151_vm3, %v1723_v38, 0.0 }
 0xc39   :  { %1728 = vadd.xlane.f32.xlu1 %v1727_v40  ;;  %4363 = vmatprep.subr.bf16.mxu1 %v4362_v51 }
 0xc3a   :  { %4365 = vmatpush3.bf16.msra.mxu1 %v4362_v51 }
 0xc3b   :  { %4367 = vmatprep.subr.bf16.mxu1 %v4366_v54 }
 0xc3e   :  { %4369 = vmatpush3.bf16.msra.mxu1 %v4366_v54 }
 0xcc5   :  { %v1732_v41 = vpop.xlane.xlu0 %1731 }
 0xcc6   :  { %v1734_v42 = vmul.f32 0.03125, %v1732_v41  ;;  %v1729_v43 = vpop.xlane.xlu1 %1728 }
 0xcc7   :  { %v1733_v44 = vmul.f32 0.03125, %v1729_v43 }
 0xcc8   :  { %v1736_v45 = vsub.f32 %v1724_v37, %v1734_v42 }
 0xcc9   :  { %v1735_v46 = vsub.f32 %v1723_v38, %v1733_v44 }
 0xcca   :  { %v1738_v47 = vmul.f32 %v1736_v45, %v1736_v45 }
 0xccb   :  { %v1737_v48 = vmul.f32 %v1735_v46, %v1735_v46 }
 0xccc   :  { %v1742_v49 = vsel %vm151_vm3, %v1738_v47, 0.0  ;;  %v3872_v47 = vld [vmem:[#allocation3 + $0x128] ss:$0 sm:$0xff] }
 0xccd   :  { %1743 = vadd.xlane.f32.xlu1 %v1742_v49  ;;  %v1739_v61 = vsel %vm151_vm3, %v1737_v48, 0.0 }
 0xcce   :  { %1740 = vadd.xlane.f32.xlu0 %v1739_v61 }
 0xd5a   :  { %v1744_v55 = vpop.xlane.xlu1 %1743 }
 0xd5b   :  { %v1746_v56 = vmul.f32 0.03125, %v1744_v55  ;;  %v1741_v57 = vpop.xlane.xlu0 %1740 }
 0xd5c   :  { %v1745_v58 = vmul.f32 0.03125, %v1741_v57 }
 0xd5d   :  { %v1748_v60 = vadd.f32 1e-12, %v1746_v56 }
 0xd5e   :  { %v1747_v62 = vadd.f32 1e-12, %v1745_v58 }
 0xd5f   :  { %4483 = vrsqrt.f32 %v1748_v60 }
 0xd60   :  { %4485 = vrsqrt.f32 %v1747_v62 }
 0xd69   :  { %v4484_v63 = vpop.eup %4483 }
 0xd6a   :  { %v4486_v3 = vpop.eup %4485  ;;  %v1752_v4 = vmul.f32 %v4484_v63, %v1736_v45 }
 0xd6b   :  { %v1751_v5 = vmul.f32 %v4486_v3, %v1735_v46 }
 0xd6c   :  { %v1758_v7 = vmul.f32 %v3867_v1, %v1752_v4  ;;  %v2009_v4 = vld [vmem:[#allocation3 + $0x140] sm:$0xff] }
 0xd6d   :  { %v1757_v0 = vmul.f32 %v3867_v1, %v1751_v5  ;;  %v2010_v5 = vld [vmem:[#allocation3 + $0x148] sm:$0xff] }
 0xd6e   :  { %v1764_v9 = vadd.f32 %v3868_v6, %v1758_v7  ;;  %v2011_v7 = vld [vmem:[#allocation3 + $0x150] sm:$0xff] }
 0xd6f   :  { %v1763_v8 = vadd.f32 %v3868_v6, %v1757_v0  ;;  %v4386_v6 = vpack.c.bf16 %v2010_v5, %v2009_v4  ;;  %v2012_v0 = vld [vmem:[#allocation3 + $0x158] sm:$0xff] }
 0xd71   :  { %4176 = vmatprep.mubr.msk.f32.mxu1 %vm151_vm3, %v1763_v8  ;;  %4387 = vmatprep.subr.bf16.mxu1 %v4386_v6 }
 0xd72   :  { %4177 = vmatmul.mubr.msk.f32.vlgmr.msra.gmra.mrb[22].mxu1 %vm151_vm3, %v1764_v9 }
 0xd73   :  { %4389 = vmatpush3.bf16.msra.mxu1 %v4386_v6 }
 0xe45   :  { %v4178_v26 = vpop.f32.mrb[22].mxu1 }
 0xe46   :  { %v1852_v27 = vadd.f32 %v4178_v26, %v3869_v25  ;;  %v1846_v16 = vpop.f32.mrb[23].mxu1 }
 0xe47   :  { %v1847_v28 = vadd.f32 %v3869_v25, %v1846_v16  ;;  %v3877_v16 = vld [vmem:[#allocation3 + $0x160] ss:$0 sm:$0xff] }
 0xe48   :  { %v1856_v29 = vmul.f32 %v1852_v27, %v1852_v27 }
 0xe49   :  { %v1855_v30 = vmul.f32 %v1847_v28, %v1847_v28 }
 0xe4a   :  { %v1858_v31 = vmul.f32 %v1856_v29, %v1852_v27 }
 0xe4b   :  { %v1857_v32 = vmul.f32 %v1855_v30, %v1847_v28 }
 0xe4c   :  { %v1860_v33 = vmul.f32 0.044715, %v1858_v31 }
 0xe4d   :  { %v1859_v34 = vmul.f32 0.044715, %v1857_v32 }
 0xe4e   :  { %v1862_v35 = vadd.f32 %v1860_v33, %v1852_v27 }
 0xe4f   :  { %v1861_v36 = vadd.f32 %v1859_v34, %v1847_v28 }
 0xe50   :  { %v1864_v37 = vmul.f32 0.7978846, %v1862_v35 }
 0xe51   :  { %v1863_v38 = vmul.f32 0.7978846, %v1861_v36 }
 0xe52   :  { %4487 = vtanh.f32 %v1864_v37 }
 0xe53   :  { %4489 = vtanh.f32 %v1863_v38 }
 0xe5c   :  { %v4488_v39 = vpop.eup %4487 }
 0xe5d   :  { %v4490_v40 = vpop.eup %4489  ;;  %v1868_v41 = vadd.f32 1.0, %v4488_v39 }
 0xe5e   :  { %v1867_v42 = vadd.f32 1.0, %v4490_v40 }
 0xe5f   :  { %v1870_v43 = vmul.f32 0.5, %v1868_v41 }
 0xe60   :  { %v1869_v44 = vmul.f32 0.5, %v1867_v42 }
 0xe61   :  { %v1872_v46 = vmul.f32 %v1870_v43, %v1852_v27 }
 0xe62   :  { %v1871_v45 = vmul.f32 %v1869_v44, %v1847_v28 }
 0xe64   :  { %4195 = vmatprep.mubr.msk.f32.mxu0 %vm67_vm0, %v1871_v45 }
 0xe65   :  { %4196 = vmatmul.mubr.msk.f32.vlgmr.msra.gmra.mrb[16].mxu0 %vm67_vm0, %v1872_v46 }
 0xe66   :  { %4221 = vmatprep.mubr.msk.f32.mxu0 %vm4592_vm4, %v4591_v15 }
 0xf38   :  { %v4197_v48 = vpop.f32.mrb[16].mxu0 }
 0xf39   :  { %v1964_v49 = vadd.f32 %v4197_v48, %v3872_v47  ;;  %v1958_v61 = vpop.f32.mrb[17].mxu0 }
 0xf3a   :  { %v1959_v59 = vadd.f32 %v3872_v47, %v1958_v61 }
 0xf3b   :  { %v1968_v50 = vadd.f32 %v1964_v49, %v1764_v9 }
 0xf3c   :  { %v1967_v51 = vadd.f32 %v1959_v59, %v1763_v8  ;;  %v4390_v8 = vpack.c.bf16 %v2012_v0, %v2011_v7 }
 0xf3d   :  { %v1974_v52 = vsel %vm151_vm3, %v1968_v50, 0.0 }
 0xf3e   :  { %1975 = vadd.xlane.f32.xlu1 %v1974_v52  ;;  %v1971_v53 = vsel %vm151_vm3, %v1967_v51, 0.0  ;;  %4391 = vmatprep.subr.bf16.mxu1 %v4390_v8 }
 0xf3f   :  { %1972 = vadd.xlane.f32.xlu0 %v1971_v53  ;;  %4393 = vmatpush3.bf16.msra.mxu1 %v4390_v8 }
 0xf40   :  { %4209 = vmatprep.subr.mxu1 %v4591_v15 }
 0xfcb   :  { %v1976_v54 = vpop.xlane.xlu1 %1975 }
 0xfcc   :  { %v1978_v55 = vmul.f32 0.03125, %v1976_v54  ;;  %v1973_v56 = vpop.xlane.xlu0 %1972 }
 0xfcd   :  { %v1977_v57 = vmul.f32 0.03125, %v1973_v56 }
 0xfce   :  { %v1980_v58 = vsub.f32 %v1968_v50, %v1978_v55 }
 0xfcf   :  { %v1979_v60 = vsub.f32 %v1967_v51, %v1977_v57 }
 0xfd0   :  { %v1982_v62 = vmul.f32 %v1980_v58, %v1980_v58 }
 0xfd1   :  { %v1981_v63 = vmul.f32 %v1979_v60, %v1979_v60 }
 0xfd2   :  { %v1986_v1 = vsel %vm151_vm3, %v1982_v62, 0.0 }
 0xfd3   :  { %1987 = vadd.xlane.f32.xlu1 %v1986_v1  ;;  %v1983_v3 = vsel %vm151_vm3, %v1981_v63, 0.0 }
 0xfd4   :  { %1984 = vadd.xlane.f32.xlu0 %v1983_v3 }
0x1060   :  { %v1988_v9 = vpop.xlane.xlu1 %1987 }
0x1061   :  { %v1990_v2 = vmul.f32 0.03125, %v1988_v9  ;;  %v1985_v10 = vpop.xlane.xlu0 %1984 }
0x1062   :  { %v1989_v11 = vmul.f32 0.03125, %v1985_v10 }
0x1063   :  { %v1992_v12 = vadd.f32 1e-12, %v1990_v2 }
0x1064   :  { %v1991_v13 = vadd.f32 1e-12, %v1989_v11 }
0x1065   :  { %4491 = vrsqrt.f32 %v1992_v12 }
0x1066   :  { %4493 = vrsqrt.f32 %v1991_v13 }
0x106f   :  { %v4492_v14 = vpop.eup %4491 }
0x1070   :  { %v4494_v18 = vpop.eup %4493  ;;  %v1996_v20 = vmul.f32 %v4492_v14, %v1980_v58 }
0x1071   :  { %v1995_v21 = vmul.f32 %v4494_v18, %v1979_v60 }
0x1072   :  { %v2002_v24 = vmul.f32 %v3875_v17, %v1996_v20 }
0x1073   :  { %v2001_v25 = vmul.f32 %v3875_v17, %v1995_v21 }
0x1074   :  { %v4856_v27 = vadd.f32 %v3876_v22, %v2002_v24 }
0x1075   :  { %v4854_v26 = vadd.f32 %v3876_v22, %v2001_v25 }
0x1077   :  { %4206 = vmatprep.mubr.msk.f32.mxu1 %vm151_vm3, %v4854_v26 }
0x1078   :  { %4207 = vmatmul.mubr.msk.f32.vlgmr.msra.gmra.mrb[24].mxu1 %vm151_vm3, %v4856_v27 }
0x1079   :  { %4211 = vmatprep.mubr.msk.f32.mxu1 %vm4592_vm4, %v4591_v15 }
0x114b   :  { %v4208_v28 = vpop.f32.mrb[24].mxu1 }
0x114c   :  { %v4864_v29 = vadd.f32 %v4208_v28, %v3877_v16  ;;  %v2090_v30 = vpop.f32.mrb[25].mxu1 }
0x114d   :  { %v4866_v31 = vadd.f32 %v3877_v16, %v2090_v30 }
0x114e   :  { %2177 = vrot.lane.b32.xlu1 %v4864_v29, %s4594_s2 }
0x114f   :  { %2100 = vrot.lane.b32.xlu0 %v4866_v31, %s4594_s2 }
0x1152   :  { %2347 = vrot.lane.b32.xlu1 %v4864_v29, %s4593_s0 }
0x1153   :  { %2505 = vrot.lane.b32.xlu0 %v4864_v29, %s4595_s30 }
0x1156   :  { %2427 = vrot.lane.b32.xlu1 %v4866_v31, %s4595_s30 }
0x1157   :  { %2271 = vrot.lane.b32.xlu0 %v4866_v31, %s4593_s0 }
0x11c0   :  { %v2178_v33 = vpop.permute.xlu1 %2177 }
0x11c1   :  { %v2101_v32 = vpop.permute.xlu0 %2100 }
0x11c2   :  { %4210 = vmatpush3.xpose.msk.msra.mxu1 %vm284_vm5, %v2101_v32 }
0x11c3   :  { %4214 = vmatprep.subr.mxu1 %v4591_v15 }
0x11c4   :  { %v2348_v35 = vpop.permute.xlu1 %2347 }
0x11c5   :  { %4212 = vmatmul.mubr.msk.f32.vlgmr.msra.gmra.mrb[26].mxu1 %vm284_vm5, %v4866_v31  ;;  %v2506_v34 = vpop.permute.xlu0 %2505 }
0x11c6   :  { %4215 = vmatpush3.xpose.msk.msra.mxu1 %vm284_vm5, %v2178_v33  ;;  %4216 = vmatprep.mubr.msk.f32.mxu1 %vm4592_vm4, %v4591_v15 }
0x11c7   :  { %4224 = vmatprep.subr.mxu1 %v4591_v15 }
0x11c8   :  { %v2428_v59 = vpop.permute.xlu1 %2427 }
0x11c9   :  { %4217 = vmatmul.mubr.msk.f32.vlgmr.msra.gmra.mrb[28].mxu1 %vm284_vm5, %v4864_v29  ;;  %v2272_v36 = vpop.permute.xlu0 %2271 }
0x11ca   :  { %4220 = vmatpush3.msra.mxu0 %v2272_v36  ;;  %4225 = vmatpush3.msra.mxu1 %v2348_v35 }
0x11cb   :  { %4229 = vmatprep.subr.mxu0 %v4591_v15  ;;  %4226 = vmatprep.mubr.msk.f32.mxu1 %vm4592_vm4, %v4591_v15 }
0x11cc   :  { %4234 = vmatprep.subr.mxu1 %v4591_v15 }
0x1298   :  { %v2172_v37 = vpop.f32.mrb[26].mxu1 }
0x1299   :  { %v2253_v38 = vmul.f32 0.35355338, %v2172_v37  ;;  %v4213_v39 = vpop.f32.mrb[27].mxu1 }
0x129b   :  { %v2255_v40 = vadd.f32 %v2253_v38, %v4708_v19 }
0x129c   :  { %v2249_v41 = vpop.f32.mrb[28].mxu1 }
0x129d   :  { %v2257_v42 = vmul.f32 1.442695, %v2255_v40  ;;  %v2254_v43 = vmul.f32 0.35355338, %v2249_v41  ;;  %v4218_v44 = vpop.f32.mrb[29].mxu1 }
0x129f   :  { %4495 = vpow2.f32 %v2257_v42  ;;  %v2256_v45 = vadd.f32 %v2254_v43, %v4710_v23 }
0x12a1   :  { %v2259_v46 = vmul.f32 1.442695, %v2256_v45 }
0x12a3   :  { %4497 = vpow2.f32 %v2259_v46 }
0x12a9   :  { %v4496_v47 = vpop.eup %4495 }
0x12aa   :  { %v2261_v48 = vsel %vm284_vm5, %v4496_v47, 0.0 }
0x12ab   :  { %2262 = vadd.xlane.f32.xlu1 %v2261_v48 }
0x12ad   :  { %v4498_v49 = vpop.eup %4497 }
0x12ae   :  { %v2264_v61 = vsel %vm284_vm5, %v4498_v49, 0.0 }
0x12af   :  { %2265 = vadd.xlane.f32.xlu0 %v2264_v61 }
0x12bc   :  { %2425 = vrot.lane.b32.xlu1 %v4866_v31, %s4596_s4 }
0x12c0   :  { %2675 = vrot.lane.b32.xlu1 %v4864_v29, %s4597_s1 }
0x12c4   :  { %2763 = vrot.lane.b32.xlu1 %v4866_v31, %s4598_s9 }
0x12c5   :  { %2503 = vrot.lane.b32.xlu0 %v4864_v29, %s4596_s4 }
0x12c9   :  { %2599 = vrot.lane.b32.xlu0 %v4866_v31, %s4597_s1 }
0x12cd   :  { %2841 = vrot.lane.b32.xlu0 %v4864_v29, %s4598_s9 }
0x1338   :  { %v2263_v50 = vpop.xlane.xlu1 %2262 }
0x1339   :  { %4499 = vrcp.f32 %v2263_v50 }
0x133c   :  { %v2266_v51 = vpop.xlane.xlu0 %2265  ;;  %v2426_v56 = vpop.permute.xlu1 %2425 }
0x133d   :  { %4501 = vrcp.f32 %v2266_v51 }
0x1340   :  { %v2504_v54 = vpop.permute.xlu0 %2503  ;;  %v2676_v60 = vpop.permute.xlu1 %2675 }
0x1343   :  { %v4500_v52 = vpop.eup %4499 }
0x1344   :  { %v2269_v53 = vmul.f32 %v4500_v52, %v4496_v47  ;;  %v2600_v58 = vpop.permute.xlu0 %2599  ;;  %v2764_v18 = vpop.permute.xlu1 %2763 }
0x1346   :  { %4222 = vmatmul.mubr.msk.f32.vlgmr.msra.gmra.mrb[18].mxu0 %vm284_vm5, %v2269_v53 }
0x1347   :  { %v4502_v55 = vpop.eup %4501  ;;  %4230 = vmatpush3.xpose.msk.msra.mxu0 %vm284_vm5, %v2428_v59  ;;  %4231 = vmatprep.mubr.msk.f32.mxu0 %vm4592_vm4, %v4591_v15 }
0x1348   :  { %v2270_v57 = vmul.f32 %v4502_v55, %v4498_v49  ;;  %4239 = vmatprep.subr.mxu0 %v4591_v15  ;;  %v2842_v20 = vpop.permute.xlu0 %2841 }
0x134a   :  { %4227 = vmatmul.mubr.msk.f32.vlgmr.msra.gmra.mrb[30].mxu1 %vm284_vm5, %v2270_v57  ;;  %4232 = vmatmul.mubr.msk.f32.vlgmr.msra.gmra.mrb[20].mxu0 %vm284_vm5, %v2426_v56 }
0x134b   :  { %4235 = vmatpush3.xpose.msk.msra.mxu1 %vm284_vm5, %v2506_v34  ;;  %4240 = vmatpush3.msra.mxu0 %v2600_v58 }
0x134c   :  { %4236 = vmatprep.mubr.msk.f32.mxu1 %vm4592_vm4, %v4591_v15  ;;  %4244 = vmatprep.subr.mxu1 %v4591_v15 }
0x134d   :  { %4241 = vmatprep.mubr.msk.f32.mxu0 %vm4592_vm4, %v4591_v15  ;;  %4249 = vmatprep.subr.mxu0 %v4591_v15 }
0x134e   :  { %4237 = vmatmul.mubr.msk.f32.vlgmr.msra.gmra.mrb[32].mxu1 %vm284_vm5, %v2504_v54 }
0x134f   :  { %4245 = vmatpush3.msra.mxu1 %v2676_v60  ;;  %4246 = vmatprep.mubr.msk.f32.mxu1 %vm4592_vm4, %v4591_v15 }
0x1350   :  { %4254 = vmatprep.subr.mxu1 %v4591_v15 }
0x1419   :  { %v2343_v62 = vpop.f32.mrb[18].mxu0 }
0x141a   :  { %2423 = vst.msk [vmem:[#allocation2] sm:$0xff] %vm284_vm5, %v2343_v62  ;;  %v4223_v63 = vpop.f32.mrb[19].mxu0 }
0x141d   :  { %v2419_v1 = vpop.f32.mrb[30].mxu1  ;;  %v2499_v3 = vpop.f32.mrb[20].mxu0 }
0x141e   :  { %2424 = vst.msk [vmem:[#allocation2 + $0x8] sm:$0xff] %vm284_vm5, %v2419_v1  ;;  %v2581_v4 = vmul.f32 0.35355338, %v2499_v3  ;;  %v4228_v5 = vpop.f32.mrb[31].mxu1  ;;  %v4233_v6 = vpop.f32.mrb[21].mxu0 }
0x1420   :  { %v2583_v7 = vadd.f32 %v2581_v4, %v4708_v19 }
0x1421   :  { %v2577_v0 = vpop.f32.mrb[32].mxu1 }
0x1422   :  { %v2585_v8 = vmul.f32 1.442695, %v2583_v7  ;;  %v2582_v9 = vmul.f32 0.35355338, %v2577_v0  ;;  %v4238_v2 = vpop.f32.mrb[33].mxu1 }
0x1424   :  { %4503 = vpow2.f32 %v2585_v8  ;;  %v2584_v10 = vadd.f32 %v2582_v9, %v4710_v23 }
0x1426   :  { %v2587_v11 = vmul.f32 1.442695, %v2584_v10 }
0x1428   :  { %4505 = vpow2.f32 %v2587_v11 }
0x142e   :  { %v4504_v12 = vpop.eup %4503 }
0x142f   :  { %v2589_v13 = vsel %vm284_vm5, %v4504_v12, 0.0 }
0x1430   :  { %2590 = vadd.xlane.f32.xlu1 %v2589_v13 }
0x1432   :  { %v4506_v14 = vpop.eup %4505 }
0x1433   :  { %v2592_v17 = vsel %vm284_vm5, %v4506_v14, 0.0 }
0x1434   :  { %2593 = vadd.xlane.f32.xlu0 %v2592_v17 }
0x1441   :  { %2761 = vrot.lane.b32.xlu1 %v4866_v31, %s4599_s10 }
0x1445   :  { %3011 = vrot.lane.b32.xlu1 %v4864_v29, %s4600_s11 }
0x1449   :  { %3099 = vrot.lane.b32.xlu1 %v4866_v31, %s4601_s12 }
0x144a   :  { %2839 = vrot.lane.b32.xlu0 %v4864_v29, %s4599_s10 }
0x144e   :  { %2935 = vrot.lane.b32.xlu0 %v4866_v31, %s4600_s11 }
0x1452   :  { %3177 = vrot.lane.b32.xlu0 %v4864_v29, %s4601_s12 }
0x14bd   :  { %v2591_v21 = vpop.xlane.xlu1 %2590 }
0x14be   :  { %4507 = vrcp.f32 %v2591_v21 }
0x14c1   :  { %v2594_v22 = vpop.xlane.xlu0 %2593  ;;  %v2762_v30 = vpop.permute.xlu1 %2761 }
0x14c2   :  { %4509 = vrcp.f32 %v2594_v22 }
0x14c5   :  { %v2840_v16 = vpop.permute.xlu0 %2839  ;;  %v3012_v34 = vpop.permute.xlu1 %3011 }
0x14c8   :  { %v4508_v24 = vpop.eup %4507 }
0x14c9   :  { %v2597_v25 = vmul.f32 %v4508_v24, %v4504_v12  ;;  %v2936_v33 = vpop.permute.xlu0 %2935  ;;  %v3100_v51 = vpop.permute.xlu1 %3099 }
0x14cb   :  { %4242 = vmatmul.mubr.msk.f32.vlgmr.msra.gmra.mrb[22].mxu0 %vm284_vm5, %v2597_v25 }
0x14cc   :  { %v4510_v28 = vpop.eup %4509  ;;  %4250 = vmatpush3.xpose.msk.msra.mxu0 %vm284_vm5, %v2764_v18  ;;  %4251 = vmatprep.mubr.msk.f32.mxu0 %vm4592_vm4, %v4591_v15 }
0x14cd   :  { %v2598_v32 = vmul.f32 %v4510_v28, %v4506_v14  ;;  %4259 = vmatprep.subr.mxu0 %v4591_v15  ;;  %v3178_v52 = vpop.permute.xlu0 %3177 }
0x14cf   :  { %4247 = vmatmul.mubr.msk.f32.vlgmr.msra.gmra.mrb[34].mxu1 %vm284_vm5, %v2598_v32  ;;  %4252 = vmatmul.mubr.msk.f32.vlgmr.msra.gmra.mrb[24].mxu0 %vm284_vm5, %v2762_v30  ;;  %v3435_v30 = vld [vmem:[#allocation3 + $0x168] sm:$0xff]  ;;  %v3436_v32 = vld [vmem:[#allocation3 + $0x170] sm:$0xff] }
0x14d0   :  { %4255 = vmatpush3.xpose.msk.msra.mxu1 %vm284_vm5, %v2842_v20  ;;  %4260 = vmatpush3.msra.mxu0 %v2936_v33  ;;  %v4394_v33 = vpack.c.bf16 %v3436_v32, %v3435_v30  ;;  %v3681_v30 = vld [vmem:[#allocation3 + $0x1f8] sm:$0xff]  ;;  %v3682_v32 = vld [vmem:[#allocation3 + $0x200] sm:$0xff] }
0x14d1   :  { %4256 = vmatprep.mubr.msk.f32.mxu1 %vm4592_vm4, %v4591_v15  ;;  %4264 = vmatprep.subr.mxu1 %v4591_v15 }
0x14d2   :  { %4261 = vmatprep.mubr.msk.f32.mxu0 %vm4592_vm4, %v4591_v15  ;;  %4269 = vmatprep.subr.mxu0 %v4591_v15 }
0x14d3   :  { %4257 = vmatmul.mubr.msk.f32.vlgmr.msra.gmra.mrb[36].mxu1 %vm284_vm5, %v2840_v16 }
0x14d4   :  { %4265 = vmatpush3.msra.mxu1 %v3012_v34  ;;  %4266 = vmatprep.mubr.msk.f32.mxu1 %vm4592_vm4, %v4591_v15  ;;  %v3437_v34 = vld [vmem:[#allocation3 + $0x178] sm:$0xff] }
0x14d5   :  { %4274 = vmatprep.subr.mxu1 %v4591_v15 }
0x159e   :  { %v4964_v35 = vpop.f32.mrb[22].mxu0 }
0x159f   :  { %v4243_v36 = vpop.f32.mrb[23].mxu0 }
0x15a2   :  { %v4966_v37 = vpop.f32.mrb[34].mxu1  ;;  %v2835_v38 = vpop.f32.mrb[24].mxu0 }
0x15a3   :  { %v2917_v39 = vmul.f32 0.35355338, %v2835_v38  ;;  %v4248_v40 = vpop.f32.mrb[35].mxu1  ;;  %v4253_v41 = vpop.f32.mrb[25].mxu0 }
0x15a5   :  { %v2919_v42 = vadd.f32 %v2917_v39, %v4708_v19 }
0x15a6   :  { %v2913_v43 = vpop.f32.mrb[36].mxu1 }
0x15a7   :  { %v2921_v44 = vmul.f32 1.442695, %v2919_v42  ;;  %v2918_v45 = vmul.f32 0.35355338, %v2913_v43  ;;  %v4258_v46 = vpop.f32.mrb[37].mxu1 }
0x15a9   :  { %4511 = vpow2.f32 %v2921_v44  ;;  %v2920_v47 = vadd.f32 %v2918_v45, %v4710_v23  ;;  %v3904_v45 = vld [vmem:[#allocation3 + $0x188] ss:$0 sm:$0xff] }
0x15ab   :  { %v2923_v48 = vmul.f32 1.442695, %v2920_v47 }
0x15ad   :  { %4513 = vpow2.f32 %v2923_v48 }
0x15b3   :  { %v4512_v49 = vpop.eup %4511 }
0x15b4   :  { %v2925_v61 = vsel %vm284_vm5, %v4512_v49, 0.0 }
0x15b5   :  { %2926 = vadd.xlane.f32.xlu1 %v2925_v61 }
0x15b7   :  { %v4514_v59 = vpop.eup %4513 }
0x15b8   :  { %v2928_v50 = vsel %vm284_vm5, %v4514_v59, 0.0 }
0x15b9   :  { %2929 = vadd.xlane.f32.xlu0 %v2928_v50 }
0x15c6   :  { %3097 = vrot.lane.b32.xlu1 %v4866_v31, %s4602_s13 }
0x15cf   :  { %3175 = vrot.lane.b32.xlu0 %v4864_v29, %s4602_s13 }
0x1642   :  { %v2927_v53 = vpop.xlane.xlu1 %2926 }
0x1643   :  { %4515 = vrcp.f32 %v2927_v53 }
0x1646   :  { %v2930_v54 = vpop.xlane.xlu0 %2929  ;;  %v3098_v60 = vpop.permute.xlu1 %3097 }
0x1647   :  { %4517 = vrcp.f32 %v2930_v54 }
0x164a   :  { %v3176_v62 = vpop.permute.xlu0 %3175 }
0x164d   :  { %v4516_v55 = vpop.eup %4515 }
0x164e   :  { %v2933_v56 = vmul.f32 %v4516_v55, %v4512_v49 }
0x1650   :  { %4262 = vmatmul.mubr.msk.f32.vlgmr.msra.gmra.mrb[26].mxu0 %vm284_vm5, %v2933_v56 }
0x1651   :  { %v4518_v57 = vpop.eup %4517  ;;  %4270 = vmatpush3.xpose.msk.msra.mxu0 %vm284_vm5, %v3100_v51  ;;  %4271 = vmatprep.mubr.msk.f32.mxu0 %vm4592_vm4, %v4591_v15 }
0x1652   :  { %v2934_v58 = vmul.f32 %v4518_v57, %v4514_v59  ;;  %4279 = vmatprep.subr.mxu0 %v4591_v15 }
0x1654   :  { %4267 = vmatmul.mubr.msk.f32.vlgmr.msra.gmra.mrb[38].mxu1 %vm284_vm5, %v2934_v58  ;;  %4272 = vmatmul.mubr.msk.f32.vlgmr.msra.gmra.mrb[28].mxu0 %vm284_vm5, %v3098_v60 }
0x1655   :  { %4275 = vmatpush3.xpose.msk.msra.mxu1 %vm284_vm5, %v3178_v52  ;;  %4276 = vmatprep.mubr.msk.f32.mxu1 %vm4592_vm4, %v4591_v15 }
0x1656   :  { %4284 = vmatprep.subr.mxu1 %v4591_v15  ;;  %4281 = vmatprep.mubr.msk.f32.mxu0 %vm4592_vm4, %v4591_v15 }
0x1658   :  { %4277 = vmatmul.mubr.msk.f32.vlgmr.msra.gmra.mrb[40].mxu1 %vm284_vm5, %v3176_v62 }
0x1659   :  { %4286 = vmatprep.mubr.msk.f32.mxu1 %vm4592_vm4, %v4591_v15 }
0x1723   :  { %v3007_v63 = vpop.f32.mrb[26].mxu0 }
0x1724   :  { %v4263_v1 = vpop.f32.mrb[27].mxu0 }
0x1727   :  { %v3083_v3 = vpop.f32.mrb[38].mxu1  ;;  %v3171_v4 = vpop.f32.mrb[28].mxu0 }
0x1728   :  { %v3253_v5 = vmul.f32 0.35355338, %v3171_v4  ;;  %v4268_v6 = vpop.f32.mrb[39].mxu1  ;;  %v4273_v7 = vpop.f32.mrb[29].mxu0  ;;  %v3570_v4 = vld [vmem:[#allocation3 + $0x1b8] sm:$0xff] }
0x172a   :  { %v3255_v0 = vadd.f32 %v3253_v5, %v4708_v19 }
0x172b   :  { %v3249_v8 = vpop.f32.mrb[40].mxu1 }
0x172c   :  { %v3257_v9 = vmul.f32 1.442695, %v3255_v0  ;;  %v3254_v2 = vmul.f32 0.35355338, %v3249_v8  ;;  %v4278_v10 = vpop.f32.mrb[41].mxu1 }
0x172e   :  { %4519 = vpow2.f32 %v3257_v9  ;;  %v3256_v11 = vadd.f32 %v3254_v2, %v4710_v23 }
0x1730   :  { %v3259_v12 = vmul.f32 1.442695, %v3256_v11  ;;  %v3907_v11 = vld [vmem:[#allocation3 + $0x190] ss:$0 sm:$0xff] }
0x1732   :  { %4521 = vpow2.f32 %v3259_v12 }
0x1738   :  { %v4520_v13 = vpop.eup %4519 }
0x1739   :  { %v3261_v15 = vsel %vm284_vm5, %v4520_v13, 0.0 }
0x173a   :  { %3262 = vadd.xlane.f32.xlu1 %v3261_v15 }
0x173c   :  { %v4522_v14 = vpop.eup %4521 }
0x173d   :  { %v3264_v17 = vsel %vm284_vm5, %v4522_v14, 0.0 }
0x173e   :  { %3265 = vadd.xlane.f32.xlu0 %v3264_v17 }
0x174b   :  { %3347 = vrot.lane.b32.xlu1 %v4864_v29, %s4603_s14 }
0x174f   :  { %2753 = vrot.lane.b32.xlu1 %v4964_v35, %s4589_s23  ;;  %v3438_v35 = vld [vmem:[#allocation3 + $0x180] sm:$0xff] }
0x1750   :  { %v4398_v36 = vpack.c.bf16 %v3438_v35, %v3437_v34  ;;  %v3909_v34 = vld [vmem:[#allocation3 + $0x1c0] ss:$0 sm:$0xff] }
0x1753   :  { %3089 = vrot.lane.b32.xlu1 %v3007_v63, %s4604_s15  ;;  %v3568_v63 = vld [vmem:[#allocation3 + $0x1a8] sm:$0xff] }
0x1754   :  { %3271 = vrot.lane.b32.xlu0 %v4866_v31, %s4603_s14 }
0x1758   :  { %2755 = vrot.lane.b32.xlu0 %v4966_v37, %s4589_s23 }
0x175c   :  { %3091 = vrot.lane.b32.xlu0 %v3083_v3, %s4604_s15  ;;  %v3569_v3 = vld [vmem:[#allocation3 + $0x1b0] sm:$0xff] }
0x175d   :  { %v4406_v5 = vpack.c.bf16 %v3570_v4, %v3569_v3 }
0x17c7   :  { %v3263_v19 = vpop.xlane.xlu1 %3262 }
0x17c8   :  { %4523 = vrcp.f32 %v3263_v19 }
0x17cb   :  { %v3348_v23 = vpop.permute.xlu1 %3347  ;;  %v3266_v18 = vpop.xlane.xlu0 %3265 }
0x17cc   :  { %4525 = vrcp.f32 %v3266_v18  ;;  %4285 = vmatpush3.msra.mxu1 %v3348_v23 }
0x17cf   :  { %v2754_v29 = vpop.permute.xlu1 %2753  ;;  %v3272_v20 = vpop.permute.xlu0 %3271 }
0x17d0   :  { %2759 = vst.msk [vmem:[#allocation2] sm:$0xff] %vm954_vm8, %v2754_v29  ;;  %4280 = vmatpush3.msra.mxu0 %v3272_v20  ;;  %v3675_v29 = vld [vmem:[#allocation3 + $0x1c8] sm:$0xff]  ;;  %v3676_v20 = vld [vmem:[#allocation3 + $0x1d0] sm:$0xff] }
0x17d1   :  { %4395 = vmatprep.subr.bf16.mxu0 %v4394_v33 }
0x17d2   :  { %v4524_v21 = vpop.eup %4523 }
0x17d3   :  { %v3269_v22 = vmul.f32 %v4524_v21, %v4520_v13  ;;  %v3090_v24 = vpop.permute.xlu1 %3089  ;;  %v2756_v31 = vpop.permute.xlu0 %2755  ;;  %v4410_v21 = vpack.c.bf16 %v3676_v20, %v3675_v29  ;;  %v3916_v20 = vld [vmem:[#allocation3 + $0x218] ss:$0 sm:$0xff] }
0x17d4   :  { %3095 = vst.msk [vmem:[#allocation2] sm:$0xff] %vm1291_vm9, %v3090_v24  ;;  %v3678_v24 = vld [vmem:[#allocation3 + $0x1e0] sm:$0xff] }
0x17d5   :  { %2760 = vst.msk [vmem:[#allocation2 + $0x8] sm:$0xff] %vm954_vm8, %v2756_v31  ;;  %4282 = vmatmul.mubr.msk.f32.vlgmr.msra.gmra.mrb[30].mxu0 %vm284_vm5, %v3269_v22  ;;  %v3677_v22 = vld [vmem:[#allocation3 + $0x1d8] sm:$0xff] }
0x17d6   :  { %v4526_v25 = vpop.eup %4525  ;;  %4397 = vmatpush3.bf16.msra.mxu0 %v4394_v33  ;;  %v4414_v31 = vpack.c.bf16 %v3678_v24, %v3677_v22  ;;  %v4422_v33 = vpack.c.bf16 %v3682_v32, %v3681_v30 }
0x17d7   :  { %v3270_v16 = vmul.f32 %v4526_v25, %v4522_v14  ;;  %v3092_v28 = vpop.permute.xlu0 %3091  ;;  %4399 = vmatprep.subr.bf16.mxu0 %v4398_v36  ;;  %v3908_v14 = vld [vmem:[#allocation3 + $0x198] ss:$0 sm:$0xff]  ;;  %v3679_v25 = vld [vmem:[#allocation3 + $0x1e8] sm:$0xff] }
0x17d8   :  { %3096 = vst.msk [vmem:[#allocation2 + $0x8] sm:$0xff] %vm1291_vm9, %v3092_v28 }
0x17d9   :  { %4287 = vmatmul.mubr.msk.f32.vlgmr.msra.gmra.mrb[42].mxu1 %vm284_vm5, %v3270_v16  ;;  %v3680_v16 = vld [vmem:[#allocation3 + $0x1f0] sm:$0xff] }
0x17da   :  { %4401 = vmatpush3.bf16.msra.mxu0 %v4398_v36  ;;  %v4418_v28 = vpack.c.bf16 %v3680_v16, %v3679_v25 }
0x17db   :  { %4411 = vmatprep.subr.bf16.mxu0 %v4410_v21 }
0x18a8   :  { %v3343_v37 = vpop.f32.mrb[30].mxu0 }
0x18a9   :  { %3425 = vrot.lane.b32.xlu1 %v3343_v37, %s4605_s16  ;;  %v4283_v38 = vpop.f32.mrb[31].mxu0 }
0x18ac   :  { %v3419_v39 = vpop.f32.mrb[42].mxu1 }
0x18ad   :  { %3427 = vrot.lane.b32.xlu0 %v3419_v39, %s4605_s16  ;;  %v4288_v40 = vpop.f32.mrb[43].mxu1 }
0x191b   :  { %v3426_v41 = vpop.permute.xlu1 %3425 }
0x191c   :  { %3431 = vst.msk [vmem:[#allocation2] sm:$0xff] %vm1628_vm10, %v3426_v41 }
0x191f   :  { %v3428_v42 = vpop.permute.xlu0 %3427 }
0x1920   :  { %3432 = vst.msk [vmem:[#allocation2 + $0x8] sm:$0xff] %vm1628_vm10, %v3428_v42 }
0x1923   :  { %v3433_v43 = vld [vmem:[#allocation2] sm:$0xff] }
0x1924   :  { %4297 = vmatprep.mubr.msk.f32.mxu0 %vm151_vm3, %v3433_v43 }
0x1927   :  { %v3434_v44 = vld [vmem:[#allocation2 + $0x8] sm:$0xff] }
0x1928   :  { %4298 = vmatmul.mubr.msk.f32.vlgmr.msra.gmra.mrb[32].mxu0 %vm151_vm3, %v3434_v44 }
0x1929   :  { %4413 = vmatpush3.bf16.msra.mxu0 %v4410_v21 }
0x192a   :  { %4415 = vmatprep.subr.bf16.mxu0 %v4414_v31 }
0x192d   :  { %4417 = vmatpush3.bf16.msra.mxu0 %v4414_v31 }
0x192e   :  { %4419 = vmatprep.subr.bf16.mxu0 %v4418_v28 }
0x1931   :  { %4421 = vmatpush3.bf16.msra.mxu0 %v4418_v28 }
0x1932   :  { %4423 = vmatprep.subr.bf16.mxu0 %v4422_v33 }
0x1935   :  { %4425 = vmatpush3.bf16.msra.mxu0 %v4422_v33 }
0x19fb   :  { %v4299_v46 = vpop.f32.mrb[32].mxu0 }
0x19fc   :  { %v3522_v47 = vadd.f32 %v4299_v46, %v3904_v45  ;;  %v3516_v48 = vpop.f32.mrb[33].mxu0 }
0x19fd   :  { %v3517_v49 = vadd.f32 %v3904_v45, %v3516_v48 }
0x19fe   :  { %v3526_v61 = vadd.f32 %v3522_v47, %v4856_v27 }
0x19ff   :  { %v3525_v59 = vadd.f32 %v3517_v49, %v4854_v26  ;;  %v3567_v26 = vld [vmem:[#allocation3 + $0x1a0] sm:$0xff] }
0x1a00   :  { %v3532_v50 = vsel %vm151_vm3, %v3526_v61, 0.0  ;;  %v4402_v1 = vpack.c.bf16 %v3568_v63, %v3567_v26 }
0x1a01   :  { %3533 = vadd.xlane.f32.xlu0 %v3532_v50  ;;  %v3529_v51 = vsel %vm151_vm3, %v3525_v59, 0.0 }
0x1a02   :  { %3530 = vadd.xlane.f32.xlu1 %v3529_v51  ;;  %4403 = vmatprep.subr.bf16.mxu1 %v4402_v1 }
0x1a03   :  { %4405 = vmatpush3.bf16.msra.mxu1 %v4402_v1 }
0x1a04   :  { %4407 = vmatprep.subr.bf16.mxu1 %v4406_v5 }
0x1a07   :  { %4409 = vmatpush3.bf16.msra.mxu1 %v4406_v5 }
0x1a8e   :  { %v3534_v52 = vpop.xlane.xlu0 %3533 }
0x1a8f   :  { %v3536_v53 = vmul.f32 0.03125, %v3534_v52  ;;  %v3531_v54 = vpop.xlane.xlu1 %3530 }
0x1a90   :  { %v3535_v55 = vmul.f32 0.03125, %v3531_v54 }
0x1a91   :  { %v3538_v56 = vsub.f32 %v3526_v61, %v3536_v53 }
0x1a92   :  { %v3537_v57 = vsub.f32 %v3525_v59, %v3535_v55  ;;  %v3912_v55 = vld [vmem:[#allocation3 + $0x208] ss:$0 sm:$0xff] }
0x1a93   :  { %v3540_v58 = vmul.f32 %v3538_v56, %v3538_v56 }
0x1a94   :  { %v3539_v60 = vmul.f32 %v3537_v57, %v3537_v57 }
0x1a95   :  { %v3544_v62 = vsel %vm151_vm3, %v3540_v58, 0.0 }
0x1a96   :  { %3545 = vadd.xlane.f32.xlu1 %v3544_v62  ;;  %v3541_v27 = vsel %vm151_vm3, %v3539_v60, 0.0 }
0x1a97   :  { %3542 = vadd.xlane.f32.xlu0 %v3541_v27 }
0x1b23   :  { %v3546_v6 = vpop.xlane.xlu1 %3545 }
0x1b24   :  { %v3548_v7 = vmul.f32 0.03125, %v3546_v6  ;;  %v3543_v0 = vpop.xlane.xlu0 %3542 }
0x1b25   :  { %v3547_v8 = vmul.f32 0.03125, %v3543_v0 }
0x1b26   :  { %v3550_v9 = vadd.f32 1e-12, %v3548_v7 }
0x1b27   :  { %v3549_v2 = vadd.f32 1e-12, %v3547_v8 }
0x1b28   :  { %4527 = vrsqrt.f32 %v3550_v9 }
0x1b29   :  { %4529 = vrsqrt.f32 %v3549_v2 }
0x1b32   :  { %v4528_v10 = vpop.eup %4527 }
0x1b33   :  { %v4530_v12 = vpop.eup %4529  ;;  %v3554_v13 = vmul.f32 %v4528_v10, %v3538_v56 }
0x1b34   :  { %v3553_v15 = vmul.f32 %v4530_v12, %v3537_v57 }
0x1b35   :  { %v3560_v17 = vmul.f32 %v3907_v11, %v3554_v13 }
0x1b36   :  { %v3559_v19 = vmul.f32 %v3907_v11, %v3553_v15 }
0x1b37   :  { %v3566_v18 = vadd.f32 %v3908_v14, %v3560_v17 }
0x1b38   :  { %v3565_v23 = vadd.f32 %v3908_v14, %v3559_v19  ;;  %v3915_v19 = vld [vmem:[#allocation3 + $0x210] ss:$0 sm:$0xff] }
0x1b3a   :  { %4308 = vmatprep.mubr.msk.f32.mxu1 %vm151_vm3, %v3565_v23 }
0x1b3b   :  { %4309 = vmatmul.mubr.msk.f32.vlgmr.msra.gmra.mrb[44].mxu1 %vm151_vm3, %v3566_v18 }
0x1c0e   :  { %v4310_v35 = vpop.f32.mrb[44].mxu1 }
0x1c0f   :  { %v3654_v36 = vadd.f32 %v4310_v35, %v3909_v34  ;;  %v3648_v37 = vpop.f32.mrb[45].mxu1 }
0x1c10   :  { %v3649_v38 = vadd.f32 %v3909_v34, %v3648_v37 }
0x1c11   :  { %v3658_v39 = vmul.f32 %v3654_v36, %v3654_v36 }
0x1c12   :  { %v3657_v40 = vmul.f32 %v3649_v38, %v3649_v38 }
0x1c13   :  { %v3660_v41 = vmul.f32 %v3658_v39, %v3654_v36 }
0x1c14   :  { %v3659_v42 = vmul.f32 %v3657_v40, %v3649_v38 }
0x1c15   :  { %v3662_v43 = vmul.f32 0.044715, %v3660_v41 }
0x1c16   :  { %v3661_v44 = vmul.f32 0.044715, %v3659_v42 }
0x1c17   :  { %v3664_v45 = vadd.f32 %v3662_v43, %v3654_v36 }
0x1c18   :  { %v3663_v46 = vadd.f32 %v3661_v44, %v3649_v38 }
0x1c19   :  { %v3666_v47 = vmul.f32 0.7978846, %v3664_v45 }
0x1c1a   :  { %v3665_v48 = vmul.f32 0.7978846, %v3663_v46 }
0x1c1b   :  { %4531 = vtanh.f32 %v3666_v47 }
0x1c1c   :  { %4533 = vtanh.f32 %v3665_v48 }
0x1c25   :  { %v4532_v49 = vpop.eup %4531 }
0x1c26   :  { %v4534_v61 = vpop.eup %4533  ;;  %v3670_v59 = vadd.f32 1.0, %v4532_v49 }
0x1c27   :  { %v3669_v50 = vadd.f32 1.0, %v4534_v61 }
0x1c28   :  { %v3672_v51 = vmul.f32 0.5, %v3670_v59 }
0x1c29   :  { %v3671_v52 = vmul.f32 0.5, %v3669_v50 }
0x1c2a   :  { %v3674_v54 = vmul.f32 %v3672_v51, %v3654_v36 }
0x1c2b   :  { %v3673_v53 = vmul.f32 %v3671_v52, %v3649_v38 }
0x1c2d   :  { %4327 = vmatprep.mubr.msk.f32.mxu0 %vm67_vm0, %v3673_v53 }
0x1c2e   :  { %4328 = vmatmul.mubr.msk.f32.vlgmr.msra.gmra.mrb[34].mxu0 %vm67_vm0, %v3674_v54 }
0x1d01   :  { %v4329_v56 = vpop.f32.mrb[34].mxu0 }
0x1d02   :  { %v3766_v57 = vadd.f32 %v4329_v56, %v3912_v55  ;;  %v3760_v58 = vpop.f32.mrb[35].mxu0 }
0x1d03   :  { %v3761_v60 = vadd.f32 %v3912_v55, %v3760_v58 }
0x1d04   :  { %v3770_v62 = vadd.f32 %v3766_v57, %v3566_v18 }
0x1d05   :  { %v3769_v27 = vadd.f32 %v3761_v60, %v3565_v23 }
0x1d06   :  { %v3776_v26 = vsel %vm151_vm3, %v3770_v62, 0.0 }
0x1d07   :  { %3777 = vadd.xlane.f32.xlu1 %v3776_v26  ;;  %v3773_v63 = vsel %vm151_vm3, %v3769_v27, 0.0 }
0x1d08   :  { %3774 = vadd.xlane.f32.xlu0 %v3773_v63 }
0x1d94   :  { %v3778_v1 = vpop.xlane.xlu1 %3777 }
0x1d95   :  { %v3780_v3 = vmul.f32 0.03125, %v3778_v1  ;;  %v3775_v4 = vpop.xlane.xlu0 %3774 }
0x1d96   :  { %v3779_v5 = vmul.f32 0.03125, %v3775_v4 }
0x1d97   :  { %v3782_v6 = vsub.f32 %v3770_v62, %v3780_v3 }
0x1d98   :  { %v3781_v7 = vsub.f32 %v3769_v27, %v3779_v5 }
0x1d99   :  { %v3784_v0 = vmul.f32 %v3782_v6, %v3782_v6 }
0x1d9a   :  { %v3783_v8 = vmul.f32 %v3781_v7, %v3781_v7 }
0x1d9b   :  { %v3788_v9 = vsel %vm151_vm3, %v3784_v0, 0.0 }
0x1d9c   :  { %3789 = vadd.xlane.f32.xlu1 %v3788_v9  ;;  %v3785_v2 = vsel %vm151_vm3, %v3783_v8, 0.0 }
0x1d9d   :  { %3786 = vadd.xlane.f32.xlu0 %v3785_v2 }
0x1e29   :  { %v3790_v10 = vpop.xlane.xlu1 %3789 }
0x1e2a   :  { %v3792_v11 = vmul.f32 0.03125, %v3790_v10  ;;  %v3787_v12 = vpop.xlane.xlu0 %3786 }
0x1e2b   :  { %v3791_v13 = vmul.f32 0.03125, %v3787_v12 }
0x1e2c   :  { %v3794_v15 = vadd.f32 1e-12, %v3792_v11 }
0x1e2d   :  { %v3793_v14 = vadd.f32 1e-12, %v3791_v13 }
0x1e2e   :  { %4535 = vrsqrt.f32 %v3794_v15 }
0x1e2f   :  { %4537 = vrsqrt.f32 %v3793_v14 }
0x1e38   :  { %v4536_v17 = vpop.eup %4535 }
0x1e39   :  { %v4538_v23 = vpop.eup %4537  ;;  %v3798_v18 = vmul.f32 %v4536_v17, %v3782_v6 }
0x1e3a   :  { %v3797_v29 = vmul.f32 %v4538_v23, %v3781_v7 }
0x1e3b   :  { %v3804_v21 = vmul.f32 %v3915_v19, %v3798_v18 }
0x1e3c   :  { %v3803_v22 = vmul.f32 %v3915_v19, %v3797_v29 }
0x1e3d   :  { %v3810_v24 = vadd.f32 %v3916_v20, %v3804_v21 }
0x1e3e   :  { %v3809_v31 = vadd.f32 %v3916_v20, %v3803_v22 }
0x1e3f   :  { %3813 = vst.msk [vmem:[#allocation6 + $0x1] sm:$0x1] %vm3811_vm11, %v3810_v24 }
0x1e40   :  { %3812 = vst.msk [vmem:[#allocation6] sm:$0x1] %vm3811_vm11, %v3809_v31 }
0x1e41   :  { %4572 = shalt.err (!%p4569_p12)
}
0x1e42   :  { %s4573_s22 = scalar_lea.hbm %s5047_s3, 32 }
0x1e43   :  { %p4574_p13 = scmp.ne.s32.totalorder %s5047_s3, %s4573_s22  ;;  %p4577_p0 = scmp.lt.u32.totalorder %s4573_s22, %s5047_s3 }
0x1e45   :  { %p4579_p1 = pnand %p4577_p0, %p4574_p13 }
0x1e47   :  { %4582 = shalt.err (!%p4579_p1)
}
0x1e48   :  { %3823 = dma.vmem_to_hbm [thread:$0]  %s3821_s18, 32, %s5047_s3, [#allocation5]  }
0x1e49   :  { %4585 = dma.done.wait [#allocation5], 32  }
0x1e4a   :  { %4586 = vsyncadd [#allocation5], 4294967264 }
0x1e4b   :  { %3827 = vsyncpa [#allocation4], 1 }
0x1e4c   :  { %3828 = vsyncpa [#allocation5], 1 }

</bundles_post_ra>
